<compile_context>
chip_gen: v7x
topology: tpu7x:2x2x1
jax: 0.10.0
libtpu: 0.0.40
codegen_flags: <defaults>
</compile_context>

<pallas_src>
import functools

import numpy as np
import jax
import jax.numpy as jnp
from jax.experimental import pallas as pl
from jax.experimental.pallas import tpu as pltpu


# ----------------------------------------------------------------------------
# Pallas kernel: one batch-tile (here: the whole batch) per grid step.
# ----------------------------------------------------------------------------
def convgru_kernel(xs_ref,     # [Cgp, L] f32, channels = [prev|img|event|label|zeros]
                   w_in_ref,   # [3*Ch, K*K*Cgp] bf16 fused update/reset/out(input) weights
                   w_h_ref,    # [Ch, K*K*Ch]   bf16 summed out-gate hidden-part weights
                   b_ref,      # [3*Ch, 1] f32 fused biases
                   out_ref,    # [Ch, L] f32
                   *, K, Wp):
    p = K // 2
    Ch = out_ref.shape[0]
    L = xs_ref.shape[1]

    def shifted(v, s):
        # shifted[:, j] = v[:, (j + s) mod L]  (XLU lane rotate; VPU-free).
        return v if s == 0 else pltpu.roll(v, (-s) % L, axis=1)

    x = xs_ref[...]                                              # f32 [Cgp, L]

    # --- fused update / reset / out-gate(input part) conv: ONE MXU matmul ---
    # im2col: stack the K*K tap-shifted copies along the contraction axis.
    taps = [shifted(x, (kk // K) * Wp + (kk % K)) for kk in range(K * K)]
    stack = jnp.concatenate(taps, axis=0).astype(jnp.bfloat16)   # [K*K*Cgp, L]
    acc = jnp.dot(w_in_ref[...], stack,
                  preferred_element_type=jnp.float32) + b_ref[...]

    update = jax.nn.sigmoid(acc[:Ch])
    reset = jax.nn.sigmoid(acc[Ch:2 * Ch])

    # Top-left-aligned prev state, recovered from the centre-padded prev
    # channels already in xs; exactly zero outside the valid HxW output lanes
    # (wraparound reads land on zero padding / zero tails by construction).
    prev = shifted(x[:Ch], p * Wp + p)                           # f32 [Ch, L]
    hr = prev * reset                                            # zero off valid lanes

    # --- hidden part of the (pre-summed) out-gate conv: ONE MXU matmul ------
    taps_h = [shifted(hr, (kk // K - p) * Wp + (kk % K - p)) for kk in range(K * K)]
    stack_h = jnp.concatenate(taps_h, axis=0).astype(jnp.bfloat16)  # [K*K*Ch, L]
    acc_o = acc[2 * Ch:] + jnp.dot(w_h_ref[...], stack_h,
                                   preferred_element_type=jnp.float32)

    out_gate = jnp.tanh(acc_o)
    new_state = (1.0 - update) * prev + out_gate * update
    out_ref[...] = jnp.maximum(new_state, 0.0)


# ----------------------------------------------------------------------------
# Wrapper: layout prep (padding / flattening / weight fusion) + pallas_call.
# ----------------------------------------------------------------------------
def _flatten_oihw(w):
    """PyTorch [O, I, kh, kw] -> [O, kh*kw*I]  (tap-major, matches in-kernel stack)."""
    O, I, Kh, Kw = w.shape
    return jnp.transpose(w, (0, 2, 3, 1)).reshape(O, Kh * Kw * I)


def convgru_pallas(img, event, label, prev_state, params, hidden_size, kernel_size,
                   batch_tile=None):
    """img/event/label: [B, Ci, H, W] (NCHW).  prev_state: [B, Ch, H, W] or None."""
    B, Ci, H, W = img.shape
    Ch = hidden_size
    K = kernel_size
    p = K // 2
    assert Ch % 8 == 0, "hidden_size must be a multiple of 8 (f32 sublane tile)"
    Hp, Wp = H + 2 * p, W + 2 * p
    HpWp = Hp * Wp
    N = ((HpWp + 127) // 128) * 128           # per-batch-element lane extent (128-aligned)
    Cg = Ch + 3 * Ci
    Cgp = ((Cg + 7) // 8) * 8                 # sublane-aligned stacked channel count

    bt = B if batch_tile is None else batch_tile
    assert B % bt == 0
    L = bt * N                                # lanes per grid step

    if prev_state is None:
        prev_state = jnp.zeros((B, Ch, H, W), dtype=img.dtype)

    f32, bf16 = jnp.float32, jnp.bfloat16
    img, event, label, prev_state = (a.astype(f32) for a in (img, event, label, prev_state))

    # --- activations: [Cgp, B*N] lane-dense, centre-padded per batch block ---
    stacked = jnp.concatenate([prev_state, img, event, label], axis=1)       # [B, Cg, H, W]
    stacked = jnp.pad(stacked, ((0, 0), (0, Cgp - Cg), (p, p), (p, p)))      # pad chans + spatial
    xs = jnp.pad(stacked.reshape(B, Cgp, HpWp), ((0, 0), (0, 0), (0, N - HpWp)))
    xs = jnp.transpose(xs, (1, 0, 2)).reshape(Cgp, B * N)                    # [Cgp, B*N]
    # TODO(synk): for a recurrent sequence, keep state in this layout across
    # timesteps (feed out_flat back via input_output_aliases) and hoist this
    # prologue / the epilogue reshape out of the loop.

    # --- weights: fuse gates, im2col-flatten, cast to bf16 -------------------
    def pad_in(w):  # pad the input-channel axis Cg -> Cgp with zero channels
        return jnp.pad(w, ((0, 0), (0, Cgp - w.shape[1]), (0, 0), (0, 0)))

    reorder = lambda w: jnp.concatenate([w[:, 3 * Ci:], w[:, :3 * Ci]], axis=1)  # -> prev-first
    w_update = pad_in(reorder(params["w_update"].astype(f32)))                   # [Ch, Cgp, K, K]
    w_reset = pad_in(reorder(params["w_reset"].astype(f32)))
    w_out_in = pad_in(jnp.concatenate(
        [jnp.zeros((Ch, Ch, K, K), f32),             # raw prev channels unused by out gates
         params["w_oimg"][:, :Ci].astype(f32),
         params["w_oevent"][:, :Ci].astype(f32),
         params["w_olabel"][:, :Ci].astype(f32)], axis=1))
    w_in = jnp.concatenate(
        [_flatten_oihw(w_update), _flatten_oihw(w_reset), _flatten_oihw(w_out_in)],
        axis=0).astype(bf16)                                                 # [3*Ch, K*K*Cgp]
    w_h = _flatten_oihw(
        (params["w_oimg"][:, Ci:] + params["w_oevent"][:, Ci:]
         + params["w_olabel"][:, Ci:]).astype(f32)).astype(bf16)             # [Ch, K*K*Ch]

    b_in = jnp.concatenate(
        [params["b_update"], params["b_reset"],
         params["b_oimg"] + params["b_oevent"] + params["b_olabel"]]
    ).astype(f32).reshape(3 * Ch, 1)                                         # [3*Ch, 1]

    KK = K * K
    grid_spec = pltpu.PrefetchScalarGridSpec(
        num_scalar_prefetch=0,
        grid=(B // bt,),
        in_specs=[
            pl.BlockSpec((Cgp, L), lambda i: (0, i)),
            pl.BlockSpec((3 * Ch, KK * Cgp), lambda i: (0, 0)),   # constant across steps
            pl.BlockSpec((Ch, KK * Ch), lambda i: (0, 0)),
            pl.BlockSpec((3 * Ch, 1), lambda i: (0, 0)),
        ],
        out_specs=pl.BlockSpec((Ch, L), lambda i: (0, i)),
    )

    out_flat = pl.pallas_call(
        functools.partial(convgru_kernel, K=K, Wp=Wp),
        out_shape=jax.ShapeDtypeStruct((Ch, B * N), f32),
        grid_spec=grid_spec,
        compiler_params=pltpu.CompilerParams(dimension_semantics=("parallel",)),
    )(xs, w_in, w_h, b_in)

    # Valid outputs live at lane b*N + h*Wp + w (top-left block of each batch block).
    out = out_flat.reshape(Ch, B, N)[:, :, :HpWp].reshape(Ch, B, Hp, Wp)[:, :, :H, :W]
    return jnp.transpose(out, (1, 0, 2, 3))                                  # NCHW


# ----------------------------------------------------------------------------
# Pure-JAX reference (mirrors the PyTorch forward exactly, NCHW).
# ----------------------------------------------------------------------------
def _conv2d_nchw(x, w, b):
    y = jax.lax.conv_general_dilated(
        x, w, window_strides=(1, 1), padding="SAME",
        dimension_numbers=("NCHW", "OIHW", "NCHW"))
    return y + b[None, :, None, None]


def convgru_ref(img, event, label, prev_state, params, hidden_size):
    B, Ci, H, W = img.shape
    if prev_state is None:
        prev_state = jnp.zeros((B, hidden_size, H, W), dtype=img.dtype)
    stacked = jnp.concatenate([img, event, label, prev_state], axis=1)
    update = jax.nn.sigmoid(_conv2d_nchw(stacked, params["w_update"], params["b_update"]))
    reset = jax.nn.sigmoid(_conv2d_nchw(stacked, params["w_reset"], params["b_reset"]))
    hr = prev_state * reset
    oi = _conv2d_nchw(jnp.concatenate([img, hr], 1), params["w_oimg"], params["b_oimg"])
    oe = _conv2d_nchw(jnp.concatenate([event, hr], 1), params["w_oevent"], params["b_oevent"])
    ol = _conv2d_nchw(jnp.concatenate([label, hr], 1), params["w_olabel"], params["b_olabel"])
    out_gate = jnp.tanh(oi + oe + ol)
    new_state = (1.0 - update) * prev_state + out_gate * update
    return jax.nn.relu(new_state)


# ----------------------------------------------------------------------------
# Deterministic parameter init (synthetic; shapes match the nn.Module).
# ----------------------------------------------------------------------------
def init_params(key, input_size, hidden_size, kernel_size):
    Ci, Ch, K = input_size, hidden_size, kernel_size
    Cg = 3 * Ci + Ch
    ks = jax.random.split(key, 5)
    # TODO(synk): PyTorch uses orthogonal init; deterministic scaled normals here.
    mk = lambda k, cin: 0.1 * jax.random.normal(k, (Ch, cin, K, K), jnp.float32)
    return {
        "w_update": mk(ks[0], Cg), "b_update": jnp.zeros((Ch,), jnp.float32),
        "w_reset": mk(ks[1], Cg), "b_reset": jnp.zeros((Ch,), jnp.float32),
        "w_oimg": mk(ks[2], Ci + Ch), "b_oimg": jnp.zeros((Ch,), jnp.float32),
        "w_oevent": mk(ks[3], Ci + Ch), "b_oevent": jnp.zeros((Ch,), jnp.float32),
        "w_olabel": mk(ks[4], Ci + Ch), "b_olabel": jnp.zeros((Ch,), jnp.float32),
    }


if __name__ == "__main__":
    B, Ci, Ch, H, W, K = 2, 4, 8, 16, 16, 3
    key = jax.random.PRNGKey(0)
    k_img, k_event, k_label, k_prev, k_par = jax.random.split(key, 5)

    img = jax.random.normal(k_img, (B, Ci, H, W), jnp.float32)
    event = jax.random.normal(k_event, (B, Ci, H, W), jnp.float32)
    label = jax.random.normal(k_label, (B, Ci, H, W), jnp.float32)
    prev_state = jax.random.normal(k_prev, (B, Ch, H, W), jnp.float32)
    params = init_params(k_par, Ci, Ch, K)

    out = convgru_pallas(img, event, label, prev_state, params, Ch, K)
    out = jax.block_until_ready(out)

    ref = convgru_ref(img, event, label, prev_state, params, Ch)
    np.testing.assert_allclose(np.asarray(out), np.asarray(ref), rtol=3e-2, atol=3e-2)

    print("KERNEL_OK")
</pallas_src>

<mosaic_0001>
module attributes {stable_mosaic.version = 11 : i64} {
  func.func @convgru_kernel(%arg0: i32, %arg1: memref<24x768xf32, #tpu.memory_space<vmem>>, %arg2: memref<24x216xbf16, #tpu.memory_space<vmem>>, %arg3: memref<8x72xbf16, #tpu.memory_space<vmem>>, %arg4: memref<24x1xf32, #tpu.memory_space<vmem>>, %arg5: memref<8x768xf32, #tpu.memory_space<vmem>>) attributes {dimension_semantics = [#tpu.dimension_semantics<parallel>], iteration_bounds = array<i64: 1>, scalar_prefetch = 0 : i64, scratch_operands = 0 : i64, tpu.core_type = #tpu.core_type<tc>, window_params = [{transform_indices = @transform_0, window_bounds = array<i64: 24, 768>}, {pipeline_mode = #tpu.pipeline_mode<synchronous>, transform_indices = @transform_1, window_bounds = array<i64: 24, 216>}, {pipeline_mode = #tpu.pipeline_mode<synchronous>, transform_indices = @transform_2, window_bounds = array<i64: 8, 72>}, {pipeline_mode = #tpu.pipeline_mode<synchronous>, transform_indices = @transform_3, window_bounds = array<i64: 24, 1>}, {transform_indices = @transform_4, window_bounds = array<i64: 8, 768>}]} {
    %c0 = arith.constant 0 : index
    %c0_0 = arith.constant 0 : index
    %0 = vector.load %arg1[%c0, %c0_0] : memref<24x768xf32, #tpu.memory_space<vmem>>, vector<24x768xf32>
    %c767_i32 = arith.constant 767 : i32
    %1 = tpu.dynamic_rotate %0 by %c767_i32 dim 1 : vector<24x768xf32>, i32 -> vector<24x768xf32>
    %c766_i32 = arith.constant 766 : i32
    %2 = tpu.dynamic_rotate %0 by %c766_i32 dim 1 : vector<24x768xf32>, i32 -> vector<24x768xf32>
    %c750_i32 = arith.constant 750 : i32
    %3 = tpu.dynamic_rotate %0 by %c750_i32 dim 1 : vector<24x768xf32>, i32 -> vector<24x768xf32>
    %c749_i32 = arith.constant 749 : i32
    %4 = tpu.dynamic_rotate %0 by %c749_i32 dim 1 : vector<24x768xf32>, i32 -> vector<24x768xf32>
    %c748_i32 = arith.constant 748 : i32
    %5 = tpu.dynamic_rotate %0 by %c748_i32 dim 1 : vector<24x768xf32>, i32 -> vector<24x768xf32>
    %c732_i32 = arith.constant 732 : i32
    %6 = tpu.dynamic_rotate %0 by %c732_i32 dim 1 : vector<24x768xf32>, i32 -> vector<24x768xf32>
    %c731_i32 = arith.constant 731 : i32
    %7 = tpu.dynamic_rotate %0 by %c731_i32 dim 1 : vector<24x768xf32>, i32 -> vector<24x768xf32>
    %c730_i32 = arith.constant 730 : i32
    %8 = tpu.dynamic_rotate %0 by %c730_i32 dim 1 : vector<24x768xf32>, i32 -> vector<24x768xf32>
    %9 = tpu.concatenate %0, %1, %2, %3, %4, %5, %6, %7, %8 in 0 : vector<24x768xf32>, vector<24x768xf32>, vector<24x768xf32>, vector<24x768xf32>, vector<24x768xf32>, vector<24x768xf32>, vector<24x768xf32>, vector<24x768xf32>, vector<24x768xf32> -> vector<216x768xf32>
    %10 = arith.truncf %9 : vector<216x768xf32> to vector<216x768xbf16>
    %c0_1 = arith.constant 0 : index
    %c0_2 = arith.constant 0 : index
    %11 = vector.load %arg2[%c0_1, %c0_2] : memref<24x216xbf16, #tpu.memory_space<vmem>>, vector<24x216xbf16>
    %cst = arith.constant dense<0.000000e+00> : vector<24x768xf32>
    %12 = tpu.matmul %11, %10, %cst {dimension_numbers = #tpu.dot_dimension_numbers<[1], [0], [0], [1], [0, 0, 1, 1], [], []>} : vector<24x216xbf16>, vector<216x768xbf16>, vector<24x768xf32> -> vector<24x768xf32>
    %c0_3 = arith.constant 0 : index
    %c0_4 = arith.constant 0 : index
    %13 = vector.load %arg4[%c0_3, %c0_4] : memref<24x1xf32, #tpu.memory_space<vmem>>, vector<24x1xf32>
    %14 = vector.broadcast %13 : vector<24x1xf32> to vector<24x768xf32>
    %15 = arith.addf %12, %14 : vector<24x768xf32>
    %16 = vector.extract_strided_slice %15 {offsets = [0, 0], sizes = [8, 768], strides = [1, 1]} : vector<24x768xf32> to vector<8x768xf32>
    %17 = arith.negf %16 : vector<8x768xf32>
    %18 = math.exp %17 : vector<8x768xf32>
    %cst_5 = arith.constant 1.000000e+00 : f32
    %19 = vector.broadcast %cst_5 : f32 to vector<8x768xf32>
    %20 = arith.addf %19, %18 : vector<8x768xf32>
    %21 = arith.divf %19, %20 : vector<8x768xf32>
    %22 = vector.extract_strided_slice %15 {offsets = [8, 0], sizes = [8, 768], strides = [1, 1]} : vector<24x768xf32> to vector<8x768xf32>
    %23 = arith.negf %22 : vector<8x768xf32>
    %24 = math.exp %23 : vector<8x768xf32>
    %cst_6 = arith.constant 1.000000e+00 : f32
    %25 = vector.broadcast %cst_6 : f32 to vector<8x768xf32>
    %26 = arith.addf %25, %24 : vector<8x768xf32>
    %27 = arith.divf %25, %26 : vector<8x768xf32>
    %28 = vector.extract_strided_slice %0 {offsets = [0, 0], sizes = [8, 768], strides = [1, 1]} : vector<24x768xf32> to vector<8x768xf32>
    %c749_i32_7 = arith.constant 749 : i32
    %29 = tpu.dynamic_rotate %28 by %c749_i32_7 dim 1 : vector<8x768xf32>, i32 -> vector<8x768xf32>
    %30 = arith.mulf %29, %27 : vector<8x768xf32>
    %c19_i32 = arith.constant 19 : i32
    %31 = tpu.dynamic_rotate %30 by %c19_i32 dim 1 : vector<8x768xf32>, i32 -> vector<8x768xf32>
    %c18_i32 = arith.constant 18 : i32
    %32 = tpu.dynamic_rotate %30 by %c18_i32 dim 1 : vector<8x768xf32>, i32 -> vector<8x768xf32>
    %c17_i32 = arith.constant 17 : i32
    %33 = tpu.dynamic_rotate %30 by %c17_i32 dim 1 : vector<8x768xf32>, i32 -> vector<8x768xf32>
    %c1_i32 = arith.constant 1 : i32
    %34 = tpu.dynamic_rotate %30 by %c1_i32 dim 1 : vector<8x768xf32>, i32 -> vector<8x768xf32>
    %c767_i32_8 = arith.constant 767 : i32
    %35 = tpu.dynamic_rotate %30 by %c767_i32_8 dim 1 : vector<8x768xf32>, i32 -> vector<8x768xf32>
    %c751_i32 = arith.constant 751 : i32
    %36 = tpu.dynamic_rotate %30 by %c751_i32 dim 1 : vector<8x768xf32>, i32 -> vector<8x768xf32>
    %c750_i32_9 = arith.constant 750 : i32
    %37 = tpu.dynamic_rotate %30 by %c750_i32_9 dim 1 : vector<8x768xf32>, i32 -> vector<8x768xf32>
    %c749_i32_10 = arith.constant 749 : i32
    %38 = tpu.dynamic_rotate %30 by %c749_i32_10 dim 1 : vector<8x768xf32>, i32 -> vector<8x768xf32>
    %39 = tpu.concatenate %31, %32, %33, %34, %30, %35, %36, %37, %38 in 0 : vector<8x768xf32>, vector<8x768xf32>, vector<8x768xf32>, vector<8x768xf32>, vector<8x768xf32>, vector<8x768xf32>, vector<8x768xf32>, vector<8x768xf32>, vector<8x768xf32> -> vector<72x768xf32>
    %40 = arith.truncf %39 : vector<72x768xf32> to vector<72x768xbf16>
    %41 = vector.extract_strided_slice %15 {offsets = [16, 0], sizes = [8, 768], strides = [1, 1]} : vector<24x768xf32> to vector<8x768xf32>
    %c0_11 = arith.constant 0 : index
    %c0_12 = arith.constant 0 : index
    %42 = vector.load %arg3[%c0_11, %c0_12] : memref<8x72xbf16, #tpu.memory_space<vmem>>, vector<8x72xbf16>
    %cst_13 = arith.constant dense<0.000000e+00> : vector<8x768xf32>
    %43 = tpu.matmul %42, %40, %cst_13 {dimension_numbers = #tpu.dot_dimension_numbers<[1], [0], [0], [1], [0, 0, 1, 1], [], []>} : vector<8x72xbf16>, vector<72x768xbf16>, vector<8x768xf32> -> vector<8x768xf32>
    %44 = arith.addf %41, %43 : vector<8x768xf32>
    %45 = math.tanh %44 : vector<8x768xf32>
    %cst_14 = arith.constant 1.000000e+00 : f32
    %46 = vector.broadcast %cst_14 : f32 to vector<8x768xf32>
    %47 = arith.subf %46, %21 : vector<8x768xf32>
    %48 = arith.mulf %47, %29 : vector<8x768xf32>
    %49 = arith.mulf %45, %21 : vector<8x768xf32>
    %50 = arith.addf %48, %49 : vector<8x768xf32>
    %cst_15 = arith.constant 0.000000e+00 : f32
    %51 = vector.broadcast %cst_15 : f32 to vector<8x768xf32>
    %52 = arith.maximumf %50, %51 : vector<8x768xf32>
    %c0_16 = arith.constant 0 : index
    %c0_17 = arith.constant 0 : index
    %53 = vector.load %arg5[%c0_16, %c0_17] : memref<8x768xf32, #tpu.memory_space<vmem>>, vector<8x768xf32>
    tpu.vector_store %arg5[%c0_16, %c0_17], %52 {strides = array<i32>} : memref<8x768xf32, #tpu.memory_space<vmem>>, vector<8x768xf32>,
    return
  }
  func.func @transform_0(%arg0: i32) -> (i32, i32) {
    %c0_i32 = arith.constant 0 : i32
    %c0_i32_0 = arith.constant 0 : i32
    return %c0_i32, %arg0 : i32, i32
  }
  func.func @transform_1(%arg0: i32) -> (i32, i32) {
    %c0_i32 = arith.constant 0 : i32
    %c0_i32_0 = arith.constant 0 : i32
    %c0_i32_1 = arith.constant 0 : i32
    return %c0_i32, %c0_i32_0 : i32, i32
  }
  func.func @transform_2(%arg0: i32) -> (i32, i32) {
    %c0_i32 = arith.constant 0 : i32
    %c0_i32_0 = arith.constant 0 : i32
    %c0_i32_1 = arith.constant 0 : i32
    return %c0_i32, %c0_i32_0 : i32, i32
  }
  func.func @transform_3(%arg0: i32) -> (i32, i32) {
    %c0_i32 = arith.constant 0 : i32
    %c0_i32_0 = arith.constant 0 : i32
    %c0_i32_1 = arith.constant 0 : i32
    return %c0_i32, %c0_i32_0 : i32, i32
  }
  func.func @transform_4(%arg0: i32) -> (i32, i32) {
    %c0_i32 = arith.constant 0 : i32
    %c0_i32_0 = arith.constant 0 : i32
    return %c0_i32, %arg0 : i32, i32
  }
}

</mosaic_0001>

<bundles_post_ra>
// kernel: tpu_custom_call.1
= control target key start
LH: loop header
LB: loop body
LE: loop exit
PB: predicated region body
PF: predicated region fallthrough
CT: control target
= control target key end

     0   :  { %9 = vsyncpa [#allocation3], 0  ;;  %s3209_s0 = inlined_call_operand.hbm [shape: f32[24,768], index: 0, kind: input, shape index: {}]   ;;  %s3210_s1 = inlined_call_operand.vmem [shape: bf16[24,216], index: 1, kind: input, shape index: {}]   ;;  %s3211_s2 = inlined_call_operand.vmem [shape: bf16[8,72], index: 2, kind: input, shape index: {}]   ;;  %s3212_s3 = inlined_call_operand.vmem [shape: f32[24,1], index: 3, kind: input, shape index: {}]   ;;  %s3213_s4 = inlined_call_operand.hbm [shape: f32[8,768], index: 4, kind: output, shape index: {}]  }
   0x1   :  { %10 = vsyncpa [#allocation4], 0  ;;  %s1846_s15 = smov [#allocation2]   ;;  %s1798_s19 = scalar_lea.hbm %s3209_s0, 2304 }
   0x2   :  { %s16_s16 = sshll.u32 %s1846_s15, 4  ;;  %p1799_p0 = scmp.ne.s32.totalorder %s3209_s0, %s1798_s19  ;;  %s17_s16 = int_to_ptr.vmem [resolvable:$true] %s16_s16 }
   0x3   :  { %p1802_p1 = scmp.lt.u32.totalorder %s1798_s19, %s3209_s0 }
   0x5   :  { %p1804_p2 = pnand %p1802_p1, %p1799_p0 }
   0x7   :  { %1807 = shalt.err (!%p1804_p2)
}
   0x8   :  { %s1808_s24 = scalar_lea.vmem %s17_s16, 2304  ;;  %p1813_p4 = scmp.lt.s32.totalorder %s17_s16, %s17_s16 }
   0x9   :  { %p1809_p3 = scmp.ne.s32.totalorder %s17_s16, %s1808_s24  ;;  %p1814_p5 = scmp.lt.s32.totalorder %s1808_s24, %s1808_s24 }
   0xb   :  { %p1815_p6 = por %p1814_p5, %p1813_p4 }
   0xd   :  { %p1816_p7 = pnand %p1815_p6, %p1809_p3 }
   0xf   :  { %1819 = shalt.err (!%p1816_p7)
}
  0x10   :  { %s1847_s25 = smov 768   ;;  %s1848_s26 = smov 48  }
  0x11   :  { %22 = dma.hbm_to_vmem [thread:$0]  %s3209_s0, 2304, %s17_s16, [#allocation3], %s1847_s25, %s1847_s25, %s1848_s26  }
  0x12   :  { %1842 = dma.done.wait [#allocation3], 2304  }
  0x13   :  { %1843 = vsyncadd [#allocation3], 4294964992  ;;  %v1901_v0 = vld [vmem:[#allocation2 + $0x40] sm:$0xff]  ;;  %v1903_v1 = vld [vmem:[#allocation2 + $0x68] sm:$0xff]  ;;  %s1849_s0 = smov 127   ;;  %s1850_s29 = smov 126   ;;  %v87_v43 = vlaneseq }
  0x14   :  { %v34_v2 = vld [vmem:[#allocation2 + $0x8] sm:$0xff]  ;;  %v1907_v3 = vpack.i.bf16 %v1901_v0, %v1903_v1  ;;  %v1909_v4 = vld [vmem:[#allocation2 + $0x10] sm:$0xff]  ;;  %v33_v8 = vld [vmem:[#allocation2] sm:$0xff]  ;;  %s1851_s30 = smov 110   ;;  %s1852_s5 = smov 109   ;;  %vm613_vm0 = vcmask 719872  }
  0x15   :  { %v39_v5 = vld [vmem:[#allocation2 + $0x30] sm:$0xff]  ;;  %v1914_v7 = vpack.i.bf16 %v1909_v4, %v34_v2  ;;  %v40_v9 = vld [vmem:[#allocation2 + $0x38] sm:$0xff]  ;;  %v1923_v12 = vld [vmem:[#allocation2 + $0x28] sm:$0xff]  ;;  %v1351_v19 = vpack.i.bf16 %v1901_v0, %v1909_v4  ;;  %s1853_s6 = smov 108   ;;  %s1854_s7 = smov 92   ;;  %v2067_v45 = vand.u32 127, %v87_v43 }
  0x16   :  { %v1911_v6 = vld [vmem:[#allocation2 + $0x70] sm:$0xff]  ;;  %1332 = vrot.lane.b32.xlu1 %v1907_v3, %s1849_s0  ;;  %v1326_v11 = vpack.i.bf16 %v40_v9, %v33_v8  ;;  %v1925_v13 = vld [vmem:[#allocation2 + $0x60] sm:$0xff]  ;;  %v1346_v14 = vpack.i.bf16 %v40_v9, %v34_v2  ;;  %v1932_v16 = vpack.i.bf16 %v39_v5, %v33_v8  ;;  %v1935_v17 = vld [vmem:[#allocation2 + $0x58] sm:$0xff]  ;;  %v494_v21 = vpack.c.bf16 %v40_v9, %v34_v2  ;;  %s1855_s8 = smov 91   ;;  %s1856_s9 = smov 90  }
  0x17   :  { %v1919_v10 = vpack.i.bf16 %v39_v5, %v1911_v6  ;;  %1322 = vrot.lane.b32.xlu0 %v1914_v7, %s1849_s0  ;;  %v1341_v15 = vpack.i.bf16 %v1923_v12, %v1925_v13  ;;  %v1937_v18 = vld [vmem:[#allocation2 + $0x50] sm:$0xff]  ;;  %v1944_v22 = vld [vmem:[#allocation2 + $0x20] sm:$0xff]  ;;  %v493_v23 = vpack.c.bf16 %v39_v5, %v33_v8  ;;  %v498_v24 = vpack.c.bf16 %v1935_v17, %v1923_v12  ;;  %v2016_v33 = vld [vmem:[#allocation2 + $0x18] sm:$0xff]  ;;  %s1859_s18 = smov 19   ;;  %s1860_s19 = smov 18  }
  0x18   :  { %v1551_v20 = vpack.i.bf16 %v1937_v18, %v1935_v17  ;;  %639 = vmatprep.subr.bf16.mxu1 %v494_v21  ;;  %v497_v25 = vpack.c.bf16 %v1937_v18, %v1944_v22  ;;  %v1361_v26 = vpack.i.bf16 %v1911_v6, %v1903_v1  ;;  %v1396_v27 = vpack.i.bf16 %v1901_v0, %v40_v9  ;;  %v2007_v31 = vld [vmem:[%s3210_s1 + $0x4] ss:$8 sps:$4 sm:$0xff]   ;;  %v2039_v41 = vld [vmem:[#allocation2 + $0x78] sm:$0xff]  ;;  %s1861_s20 = smov 17   ;;  %s1862_s21 = smov 1  }
  0x19   :  { %640 = vmatpush1.bf16.msra.mxu1 %v493_v23  ;;  %741 = vmatprep.subr.bf16.mxu0 %v498_v24  ;;  %v1401_v28 = vpack.i.bf16 %v1903_v1, %v39_v5  ;;  %v1406_v29 = vpack.i.bf16 %v1925_v13, %v1911_v6  ;;  %v1491_v30 = vpack.i.bf16 %v1903_v1, %v1925_v13  ;;  %v2018_v34 = vld [vmem:[#allocation2 + $0x80] sm:$0xff]  ;;  %v2022_v35 = vld [vmem:[#allocation2 + $0x88] sm:$0xff]  ;;  %vm89_vm1 = vcmp.lt.s32.totalorder %v2067_v45, 127 }
  0x1a   :  { %1337 = vrot.lane.b32.xlu1 %v1919_v10, %s1849_s0  ;;  %742 = vmatpush1.bf16.msra.mxu0 %v497_v25  ;;  %v1496_v32 = vpack.i.bf16 %v1935_v17, %v1944_v22  ;;  %v1506_v36 = vpack.i.bf16 %v2016_v33, %v2018_v34  ;;  %v1501_v37 = vpack.i.bf16 %v1937_v18, %v2022_v35  ;;  %v2037_v40 = vld [vmem:[#allocation2 + $0x48] sm:$0xff]  ;;  %vm144_vm2 = vcmp.lt.s32.totalorder %v2067_v45, 126 }
  0x1b   :  { %1327 = vrot.lane.b32.xlu0 %v1326_v11, %s1849_s0  ;;  %1263 = vmatprep.mubr.msk.bf16.mxu1 %vm613_vm0, %v2007_v31  ;;  %v1516_v38 = vpack.i.bf16 %v2022_v35, %v1937_v18  ;;  %v1511_v39 = vpack.i.bf16 %v1944_v22, %v1935_v17  ;;  %v2045_v42 = vpack.i.bf16 %v2039_v41, %v2037_v40  ;;  %vm199_vm3 = vcmp.lt.s32.totalorder %v2067_v45, 110 }
  0x1c   :  { %1269 = vmatprep.mubr.msk.bf16.mxu0 %vm613_vm0, %v2007_v31  ;;  %v1561_v44 = vpack.i.bf16 %v2018_v34, %v2022_v35  ;;  %v2095_v59 = vpack.i.bf16 %v1937_v18, %v1944_v22  ;;  %v2101_v61 = vpack.i.bf16 %v1935_v17, %v1923_v12  ;;  %vm254_vm4 = vcmp.lt.s32.totalorder %v2067_v45, 109 }
  0x1d   :  { %vm309_vm5 = vcmp.lt.s32.totalorder %v2067_v45, 108  ;;  %vm364_vm6 = vcmp.lt.s32.totalorder %v2067_v45, 92  ;;  %vm419_vm7 = vcmp.lt.s32.totalorder %v2067_v45, 91  ;;  %vm474_vm8 = vcmp.lt.s32.totalorder %v2067_v45, 90 }
  0x1e   :  { %1347 = vrot.lane.b32.xlu1 %v1346_v14, %s1850_s29  ;;  %vm620_vm9 = vcmask 1043456   ;;  %vm882_vm10 = vcmp.lt.s32.totalorder %v2067_v45, 19  ;;  %vm901_vm11 = vcmp.lt.s32.totalorder %v2067_v45, 18  ;;  %vm920_vm12 = vcmp.lt.s32.totalorder %v2067_v45, 17 }
  0x1f   :  { %1342 = vrot.lane.b32.xlu0 %v1341_v15, %s1849_s0  ;;  %vm939_vm13 = vcmp.lt.s32.totalorder %v2067_v45, 1  ;;  %vm976_vm14 = vcmp.lt.s32.totalorder %v2067_v45, 111  ;;  %vm1050_vm15 = vcmask 588800  }
  0x22   :  { %1357 = vrot.lane.b32.xlu1 %v1932_v16, %s1850_s29 }
  0x23   :  { %1352 = vrot.lane.b32.xlu0 %v1351_v19, %s1850_s29 }
  0x26   :  { %1367 = vrot.lane.b32.xlu1 %v1914_v7, %s1851_s30 }
  0x27   :  { %1362 = vrot.lane.b32.xlu0 %v1361_v26, %s1850_s29 }
  0x2a   :  { %1377 = vrot.lane.b32.xlu1 %v1326_v11, %s1851_s30 }
  0x2b   :  { %1372 = vrot.lane.b32.xlu0 %v1341_v15, %s1850_s29 }
  0x2e   :  { %1387 = vrot.lane.b32.xlu1 %v1919_v10, %s1851_s30 }
  0x2f   :  { %1382 = vrot.lane.b32.xlu0 %v1907_v3, %s1851_s30 }
  0x32   :  { %224 = vrot.lane.b32.xlu1 %v34_v2, %s1852_s5 }
  0x33   :  { %1392 = vrot.lane.b32.xlu0 %v1341_v15, %s1851_s30 }
  0x36   :  { %230 = vrot.lane.b32.xlu1 %v1909_v4, %s1852_s5 }
  0x37   :  { %1397 = vrot.lane.b32.xlu0 %v1396_v27, %s1852_s5  ;;  %v2147_v27 = vpack.i.bf16 %v2037_v40, %v2016_v33 }
  0x3a   :  { %1402 = vrot.lane.b32.xlu1 %v1401_v28, %s1852_s5  ;;  %v1606_v28 = vpack.i.bf16 %v1944_v22, %v1923_v12 }
  0x3b   :  { %218 = vrot.lane.b32.xlu0 %v33_v8, %s1852_s5 }
  0x3e   :  { %1412 = vrot.lane.b32.xlu1 %v1914_v7, %s1853_s6 }
  0x3f   :  { %1407 = vrot.lane.b32.xlu0 %v1406_v29, %s1852_s5 }
  0x42   :  { %1422 = vrot.lane.b32.xlu1 %v1907_v3, %s1853_s6 }
  0x43   :  { %1417 = vrot.lane.b32.xlu0 %v1326_v11, %s1853_s6 }
  0x46   :  { %1432 = vrot.lane.b32.xlu1 %v1341_v15, %s1853_s6 }
  0x47   :  { %1427 = vrot.lane.b32.xlu0 %v1919_v10, %s1853_s6 }
  0x4a   :  { %1442 = vrot.lane.b32.xlu1 %v1351_v19, %s1854_s7 }
  0x4b   :  { %1437 = vrot.lane.b32.xlu0 %v1346_v14, %s1854_s7 }
  0x4e   :  { %1452 = vrot.lane.b32.xlu1 %v1361_v26, %s1854_s7 }
  0x4f   :  { %1447 = vrot.lane.b32.xlu0 %v1932_v16, %s1854_s7 }
  0x52   :  { %332 = vrot.lane.b32.xlu1 %v1925_v13, %s1854_s7 }
  0x53   :  { %1457 = vrot.lane.b32.xlu0 %v1914_v7, %s1855_s8 }
  0x56   :  { %1467 = vrot.lane.b32.xlu1 %v1907_v3, %s1855_s8 }
  0x57   :  { %1462 = vrot.lane.b32.xlu0 %v1326_v11, %s1855_s8 }
  0x5a   :  { %387 = vrot.lane.b32.xlu1 %v1925_v13, %s1855_s8 }
  0x5b   :  { %1472 = vrot.lane.b32.xlu0 %v1919_v10, %s1855_s8 }
  0x5e   :  { %1482 = vrot.lane.b32.xlu1 %v1351_v19, %s1856_s9 }
  0x5f   :  { %1477 = vrot.lane.b32.xlu0 %v1346_v14, %s1856_s9 }
  0x62   :  { %1492 = vrot.lane.b32.xlu1 %v1491_v30, %s1856_s9 }
  0x63   :  { %1487 = vrot.lane.b32.xlu0 %v1932_v16, %s1856_s9 }
  0x66   :  { %1497 = vrot.lane.b32.xlu1 %v1496_v32, %s1849_s0 }
  0x67   :  { %454 = vrot.lane.b32.xlu0 %v1911_v6, %s1856_s9 }
  0x6a   :  { %1507 = vrot.lane.b32.xlu1 %v1506_v36, %s1849_s0 }
  0x6b   :  { %1502 = vrot.lane.b32.xlu0 %v1501_v37, %s1849_s0 }
  0x6e   :  { %1517 = vrot.lane.b32.xlu1 %v1516_v38, %s1850_s29 }
  0x6f   :  { %1512 = vrot.lane.b32.xlu0 %v1511_v39, %s1850_s29 }
  0x72   :  { %1527 = vrot.lane.b32.xlu1 %v1506_v36, %s1850_s29 }
  0x73   :  { %1522 = vrot.lane.b32.xlu0 %v2045_v42, %s1849_s0 }
  0x76   :  { %1537 = vrot.lane.b32.xlu1 %v2045_v42, %s1850_s29 }
  0x77   :  { %1532 = vrot.lane.b32.xlu0 %v1496_v32, %s1851_s30 }
  0x7a   :  { %1547 = vrot.lane.b32.xlu1 %v1506_v36, %s1851_s30 }
  0x7b   :  { %1542 = vrot.lane.b32.xlu0 %v1501_v37, %s1851_s30 }
  0x7e   :  { %1552 = vrot.lane.b32.xlu1 %v1551_v20, %s1852_s5 }
  0x7f   :  { %248 = vrot.lane.b32.xlu0 %v1923_v12, %s1852_s5 }
  0x82   :  { %1557 = vrot.lane.b32.xlu1 %v2045_v42, %s1851_s30 }
  0x83   :  { %242 = vrot.lane.b32.xlu0 %v1944_v22, %s1852_s5 }
  0x86   :  { %1567 = vrot.lane.b32.xlu1 %v1496_v32, %s1853_s6 }
  0x87   :  { %1562 = vrot.lane.b32.xlu0 %v1561_v44, %s1852_s5 }
  0x88   :  { %v2071_v46 = vpop.permute.xlu1 %1332 }
  0x89   :  { %v2073_v47 = vpop.permute.xlu0 %1322  ;;  %v1334_v52 = vunpack.i.l.bf16 %v2071_v46  ;;  %v3240_v56 = vunpack.i.h.bf16 %v2071_v46 }
  0x8a   :  { %v3253_v48 = vunpack.i.h.bf16 %v2073_v47  ;;  %v1324_v49 = vunpack.i.l.bf16 %v2073_v47  ;;  %1572 = vrot.lane.b32.xlu1 %v2045_v42, %s1852_s5 }
  0x8b   :  { %236 = vrot.lane.b32.xlu0 %v2016_v33, %s1852_s5 }
  0x8c   :  { %v2082_v50 = vpop.permute.xlu1 %1337  ;;  %v99_v51 = vsel %vm89_vm1, %v1324_v49, %v3253_v48 }
  0x8d   :  { %v3242_v53 = vunpack.i.l.bf16 %v2082_v50  ;;  %v1328_v54 = vpop.permute.xlu0 %1327  ;;  %v500_v55 = vpack.c.bf16 %v99_v51, %v1903_v1  ;;  %v1340_v60 = vunpack.i.h.bf16 %v2082_v50  ;;  %v1616_v51 = vpack.i.bf16 %v2022_v35, %v1935_v17 }
  0x8e   :  { %v1330_v57 = vunpack.i.h.bf16 %v1328_v54  ;;  %v1329_v58 = vunpack.i.l.bf16 %v1328_v54  ;;  %1582 = vrot.lane.b32.xlu1 %v1506_v36, %s1853_s6 }
  0x8f   :  { %1577 = vrot.lane.b32.xlu0 %v1501_v37, %s1853_s6  ;;  %641 = vmatprep.subr.bf16.mxu1 %v500_v55  ;;  %v101_v62 = vsel %vm89_vm1, %v1334_v52, %v3242_v53 }
  0x90   :  { %v1348_v63 = vpop.permute.xlu1 %1347  ;;  %v102_v1 = vsel %vm89_vm1, %v1329_v58, %v1324_v49  ;;  %v100_v2 = vsel %vm89_vm1, %v1330_v57, %v3240_v56  ;;  %v103_v10 = vsel %vm89_vm1, %v1340_v60, %v1330_v57  ;;  %v1621_v49 = vpack.i.bf16 %v2018_v34, %v1937_v18 }
  0x91   :  { %v2113_v3 = vpop.permute.xlu0 %1342  ;;  %v499_v5 = vpack.c.bf16 %v102_v1, %v1925_v13  ;;  %v506_v7 = vpack.c.bf16 %v101_v62, %v100_v2  ;;  %v1350_v11 = vunpack.i.h.bf16 %v1348_v63  ;;  %v1349_v13 = vunpack.i.l.bf16 %v1348_v63 }
  0x92   :  { %v1345_v8 = vunpack.i.h.bf16 %v2113_v3  ;;  %v3255_v9 = vunpack.i.l.bf16 %v2113_v3  ;;  %1592 = vrot.lane.b32.xlu1 %v2095_v59, %s1854_s7 }
  0x93   :  { %1587 = vrot.lane.b32.xlu0 %v2101_v61, %s1854_s7  ;;  %642 = vmatpush1.bf16.msra.mxu1 %v499_v5 }
  0x94   :  { %643 = vmatprep.subr.bf16.mxu1 %v506_v7  ;;  %v2127_v14 = vpop.permute.xlu1 %1357  ;;  %v104_v15 = vsel %vm89_vm1, %v3255_v9, %v1334_v52  ;;  %v105_v16 = vsel %vm89_vm1, %v1345_v8, %v1329_v58 }
  0x95   :  { %v3244_v19 = vunpack.i.h.bf16 %v2127_v14  ;;  %v3246_v20 = vunpack.i.l.bf16 %v2127_v14  ;;  %v2139_v21 = vpop.permute.xlu0 %1352  ;;  %v505_v23 = vpack.c.bf16 %v104_v15, %v103_v10  ;;  %v504_v24 = vpack.c.bf16 %v105_v16, %v2022_v35 }
  0x96   :  { %v3238_v25 = vunpack.i.h.bf16 %v2139_v21  ;;  %v3239_v26 = vunpack.i.l.bf16 %v2139_v21  ;;  %1602 = vrot.lane.b32.xlu1 %v1561_v44, %s1854_s7 }
  0x97   :  { %1597 = vrot.lane.b32.xlu0 %v2045_v42, %s1853_s6  ;;  %644 = vmatpush1.bf16.msra.mxu1 %v505_v23  ;;  %v157_v29 = vsel %vm144_vm2, %v3246_v20, %v1349_v13  ;;  %v158_v30 = vsel %vm144_vm2, %v3244_v19, %v1350_v11 }
  0x98   :  { %743 = vmatprep.subr.bf16.mxu0 %v504_v24  ;;  %v2161_v32 = vpop.permute.xlu1 %1367  ;;  %v154_v36 = vsel %vm144_vm2, %v1349_v13, %v3239_v26  ;;  %v155_v12 = vsel %vm144_vm2, %v1350_v11, %v3238_v25  ;;  %v511_v22 = vpack.c.bf16 %v158_v30, %v157_v29 }
  0x99   :  { %v3228_v37 = vunpack.i.h.bf16 %v2161_v32  ;;  %v1369_v38 = vunpack.i.l.bf16 %v2161_v32  ;;  %v2174_v39 = vpop.permute.xlu0 %1362  ;;  %v512_v42 = vpack.c.bf16 %v155_v12, %v154_v36  ;;  %v1641_v36 = vpack.i.bf16 %v2022_v35, %v2018_v34 }
  0x9a   :  { %v3235_v43 = vunpack.i.h.bf16 %v2174_v39  ;;  %v1364_v44 = vunpack.i.l.bf16 %v2174_v39  ;;  %1612 = vrot.lane.b32.xlu1 %v2147_v27, %s1854_s7 }
  0x9b   :  { %1607 = vrot.lane.b32.xlu0 %v1606_v28, %s1855_s8  ;;  %645 = vmatprep.subr.bf16.mxu1 %v512_v42  ;;  %v209_v52 = vsel %vm199_vm3, %v1369_v38, %v3228_v37 }
  0x9c   :  { %646 = vmatpush1.bf16.msra.mxu1 %v511_v22  ;;  %v2189_v54 = vpop.permute.xlu1 %1377  ;;  %v156_v55 = vsel %vm144_vm2, %v1364_v44, %v3235_v43 }
  0x9d   :  { %v3243_v18 = vunpack.i.l.bf16 %v2189_v54  ;;  %v2196_v57 = vpop.permute.xlu0 %1372  ;;  %v518_v58 = vpack.c.bf16 %v209_v52, %v156_v55  ;;  %v1380_v10 = vunpack.i.h.bf16 %v2189_v54 }
  0x9e   :  { %v3245_v17 = vunpack.i.l.bf16 %v2196_v57  ;;  %1622 = vrot.lane.b32.xlu1 %v1621_v49, %s1855_s8 }
  0x9f   :  { %1617 = vrot.lane.b32.xlu0 %v1616_v51, %s1855_s8  ;;  %647 = vmatprep.subr.bf16.mxu1 %v518_v58  ;;  %v212_v62 = vsel %vm199_vm3, %v3243_v18, %v1369_v38 }
  0xa0   :  { %v2205_v63 = vpop.permute.xlu1 %1387  ;;  %v159_v1 = vsel %vm144_vm2, %v3245_v17, %v1364_v44 }
  0xa1   :  { %v3218_v2 = vunpack.i.l.bf16 %v2205_v63  ;;  %v2212_v5 = vpop.permute.xlu0 %1382  ;;  %v517_v7 = vpack.c.bf16 %v212_v62, %v159_v1  ;;  %v3227_v15 = vunpack.i.h.bf16 %v2205_v63 }
  0xa2   :  { %v3220_v11 = vunpack.i.h.bf16 %v2212_v5  ;;  %v1384_v13 = vunpack.i.l.bf16 %v2212_v5  ;;  %1627 = vrot.lane.b32.xlu1 %v2147_v27, %s1855_s8 }
  0xa3   :  { %350 = vrot.lane.b32.xlu0 %v2039_v41, %s1854_s7  ;;  %648 = vmatpush1.bf16.msra.mxu1 %v517_v7  ;;  %v213_v22 = vsel %vm199_vm3, %v3227_v15, %v1380_v10 }
  0xa4   :  { %v225_v16 = vpop.permute.xlu1 %224  ;;  %v210_v23 = vsel %vm199_vm3, %v1380_v10, %v3220_v11  ;;  %v211_v24 = vsel %vm199_vm3, %v1384_v13, %v3218_v2 }
  0xa5   :  { %v2230_v28 = vpop.permute.xlu0 %1392  ;;  %v524_v29 = vpack.c.bf16 %v211_v24, %v210_v23 }
  0xa6   :  { %v3225_v30 = vunpack.i.l.bf16 %v2230_v28  ;;  %1637 = vrot.lane.b32.xlu1 %v2095_v59, %s1856_s9 }
  0xa7   :  { %1632 = vrot.lane.b32.xlu0 %v2101_v61, %s1856_s9  ;;  %649 = vmatprep.subr.bf16.mxu1 %v524_v29 }
  0xa8   :  { %v2239_v12 = vpop.permute.xlu1 %230  ;;  %v214_v38 = vsel %vm199_vm3, %v3225_v30, %v1384_v13  ;;  %v3214_v13 = vmov 0  }
  0xa9   :  { %v2250_v59 = vpop.permute.xlu0 %1397  ;;  %v523_v35 = vpack.c.bf16 %v214_v38, %v213_v22  ;;  %v2260_v44 = vsel %vm254_vm4, %v225_v16, %v2239_v12  ;;  %1651 = vset.pattern.permute.xlu0 %v3214_v13  ;;  %1732 = vset.pattern.permute.xlu1 %v3214_v13 }
  0xaa   :  { %v3216_v61 = vunpack.i.h.bf16 %v2250_v59  ;;  %v1399_v42 = vunpack.i.l.bf16 %v2250_v59  ;;  %1642 = vrot.lane.b32.xlu1 %v1641_v36, %s1856_s9  ;;  %3261 = vst [vmem:[#allocation8_spill] sm:$0xff] %v2260_v44 }
  0xab   :  { %405 = vrot.lane.b32.xlu0 %v2039_v41, %s1855_s8  ;;  %650 = vmatpush1.bf16.msra.mxu1 %v523_v35 }
  0xac   :  { %v2262_v49 = vpop.permute.xlu1 %1402  ;;  %v265_v51 = vsel %vm254_vm4, %v1399_v42, %v3216_v61 }
  0xad   :  { %v3224_v52 = vunpack.i.l.bf16 %v2262_v49  ;;  %v2269_v55 = vpop.permute.xlu0 %218  ;;  %v530_v58 = vpack.c.bf16 %v265_v51, %v2260_v44  ;;  %v1405_v29 = vunpack.i.h.bf16 %v2262_v49 }
  0xae   :  { %460 = vrot.lane.b32.xlu1 %v2039_v41, %s1856_s9  ;;  %v2277_v62 = vsel %vm254_vm4, %v2269_v55, %v225_v16  ;;  %v581_v16 = vld [vmem:[%s3212_s3 + $0x8] sm:$0xff] }
  0xaf   :  { %3262 = vst [vmem:[#allocation9_spill] sm:$0xff] %v2277_v62  ;;  %1647 = vrot.lane.b32.xlu0 %v2147_v27, %s1856_s9  ;;  %651 = vmatprep.subr.bf16.mxu1 %v530_v58  ;;  %v268_v1 = vsel %vm254_vm4, %v3224_v52, %v1399_v42 }
  0xb0   :  { %v2285_v7 = vpop.permute.xlu1 %1412  ;;  %v529_v10 = vpack.c.bf16 %v268_v1, %v2277_v62 }
  0xb1   :  { %v3217_v27 = vunpack.i.h.bf16 %v2285_v7  ;;  %v1414_v23 = vunpack.i.l.bf16 %v2285_v7  ;;  %v2296_v24 = vpop.permute.xlu0 %1407 }
  0xb2   :  { %v3219_v36 = vunpack.i.l.bf16 %v2296_v24  ;;  %652 = vmatpush1.bf16.msra.mxu1 %v529_v10  ;;  %v3221_v38 = vunpack.i.h.bf16 %v2296_v24 }
  0xb3   :  { %v319_v22 = vsel %vm309_vm5, %v1414_v23, %v3217_v27  ;;  %590 = vperm.xlu0 %1651, %v581_v16  }
  0xb4   :  { %v2305_v35 = vpop.permute.xlu1 %1422  ;;  %v266_v42 = vsel %vm254_vm4, %v1405_v29, %v3219_v36  ;;  %v269_v16 = vsel %vm254_vm4, %v3221_v38, %v1405_v29 }
  0xb5   :  { %v1418_v51 = vpop.permute.xlu0 %1417  ;;  %v536_v58 = vpack.c.bf16 %v319_v22, %v266_v42  ;;  %v3226_v10 = vunpack.i.h.bf16 %v2305_v35  ;;  %v1424_v2 = vunpack.i.l.bf16 %v2305_v35 }
  0xb6   :  { %v1419_v1 = vunpack.i.l.bf16 %v1418_v51  ;;  %v1420_v13 = vunpack.i.h.bf16 %v1418_v51 }
  0xb7   :  { %653 = vmatprep.subr.bf16.mxu1 %v536_v58 }
  0xb8   :  { %v2312_v61 = vpop.permute.xlu1 %1432  ;;  %v322_v27 = vsel %vm309_vm5, %v1419_v1, %v1414_v23 }
  0xb9   :  { %v3223_v36 = vunpack.i.h.bf16 %v2312_v61  ;;  %v3222_v22 = vunpack.i.l.bf16 %v2312_v61  ;;  %v2323_v42 = vpop.permute.xlu0 %1427  ;;  %v535_v58 = vpack.c.bf16 %v322_v27, %v269_v16  ;;  %v320_v27 = vsel %vm309_vm5, %v1420_v13, %v3226_v10 }
  0xba   :  { %v3232_v51 = vunpack.i.h.bf16 %v2323_v42  ;;  %v3229_v11 = vunpack.i.l.bf16 %v2323_v42 }
  0xbb   :  { %654 = vmatpush1.bf16.msra.mxu1 %v535_v58  ;;  %v324_v29 = vsel %vm309_vm5, %v3222_v22, %v1424_v2  ;;  %v2335_v23 = vsel %vm309_vm5, %v3223_v36, %v1419_v1 }
  0xbc   :  { %v2337_v38 = vpop.permute.xlu1 %1442  ;;  %v321_v16 = vsel %vm309_vm5, %v1424_v2, %v3229_v11  ;;  %v323_v58 = vsel %vm309_vm5, %v3232_v51, %v1420_v13 }
  0xbd   :  { %v3230_v1 = vunpack.i.h.bf16 %v2337_v38  ;;  %v3231_v22 = vunpack.i.l.bf16 %v2337_v38  ;;  %v1438_v36 = vpop.permute.xlu0 %1437  ;;  %v542_v52 = vpack.c.bf16 %v321_v16, %v320_v27  ;;  %v541_v30 = vpack.c.bf16 %v324_v29, %v323_v58 }
  0xbe   :  { %v1440_v10 = vunpack.i.h.bf16 %v1438_v36  ;;  %v1439_v15 = vunpack.i.l.bf16 %v1438_v36 }
  0xbf   :  { %655 = vmatprep.subr.bf16.mxu1 %v542_v52 }
  0xc0   :  { %656 = vmatpush1.bf16.msra.mxu1 %v541_v30  ;;  %v2354_v37 = vpop.permute.xlu1 %1452  ;;  %v374_v2 = vsel %vm364_vm6, %v1439_v15, %v3231_v22  ;;  %v375_v13 = vsel %vm364_vm6, %v1440_v10, %v3230_v1 }
  0xc1   :  { %v2364_v11 = vpop.permute.xlu0 %1447  ;;  %v548_v27 = vpack.c.bf16 %v375_v13, %v374_v2  ;;  %v3236_v30 = vunpack.i.h.bf16 %v2354_v37  ;;  %v1454_v36 = vunpack.i.l.bf16 %v2354_v37 }
  0xc2   :  { %v3233_v29 = vunpack.i.h.bf16 %v2364_v11  ;;  %v3234_v52 = vunpack.i.l.bf16 %v2364_v11 }
  0xc3   :  { %657 = vmatprep.subr.bf16.mxu1 %v548_v27 }
  0xc4   :  { %v2370_v16 = vpop.permute.xlu1 %332  ;;  %v377_v58 = vsel %vm364_vm6, %v3234_v52, %v1439_v15  ;;  %v378_v2 = vsel %vm364_vm6, %v3233_v29, %v1440_v10  ;;  %v376_v15 = vsel %vm364_vm6, %v1454_v36, %v3236_v30 }
  0xc5   :  { %v2380_v13 = vpop.permute.xlu0 %1457  ;;  %v547_v1 = vpack.c.bf16 %v378_v2, %v377_v58 }
  0xc6   :  { %v3237_v27 = vunpack.i.h.bf16 %v2380_v13  ;;  %v1459_v22 = vunpack.i.l.bf16 %v2380_v13 }
  0xc7   :  { %658 = vmatpush1.bf16.msra.mxu1 %v547_v1  ;;  %v379_v1 = vsel %vm364_vm6, %v2370_v16, %v1454_v36 }
  0xc8   :  { %v2385_v51 = vpop.permute.xlu1 %1467  ;;  %v429_v10 = vsel %vm419_vm7, %v1459_v22, %v3237_v27 }
  0xc9   :  { %v2395_v58 = vpop.permute.xlu0 %1462  ;;  %v554_v2 = vpack.c.bf16 %v429_v10, %v376_v15  ;;  %v3247_v52 = vunpack.i.h.bf16 %v2385_v51  ;;  %v1469_v10 = vunpack.i.l.bf16 %v2385_v51 }
  0xca   :  { %v3241_v29 = vunpack.i.l.bf16 %v2395_v58  ;;  %v1465_v43 = vunpack.i.h.bf16 %v2395_v58 }
  0xcb   :  { %659 = vmatprep.subr.bf16.mxu1 %v554_v2 }
  0xcc   :  { %v2403_v30 = vpop.permute.xlu1 %387  ;;  %v432_v27 = vsel %vm419_vm7, %v3241_v29, %v1459_v22  ;;  %v430_v22 = vsel %vm419_vm7, %v1465_v43, %v3247_v52 }
  0xcd   :  { %v2409_v25 = vpop.permute.xlu0 %1472  ;;  %v553_v15 = vpack.c.bf16 %v432_v27, %v379_v1  ;;  %v434_v26 = vsel %vm419_vm7, %v2403_v30, %v1469_v10 }
  0xce   :  { %v3251_v2 = vunpack.i.h.bf16 %v2409_v25  ;;  %v3248_v36 = vunpack.i.l.bf16 %v2409_v25 }
  0xcf   :  { %660 = vmatpush1.bf16.msra.mxu1 %v553_v15 }
  0xd0   :  { %v2418_v56 = vpop.permute.xlu1 %1482  ;;  %v431_v27 = vsel %vm419_vm7, %v1469_v10, %v3248_v36  ;;  %v433_v1 = vsel %vm419_vm7, %v3251_v2, %v1465_v43 }
  0xd1   :  { %v3250_v15 = vunpack.i.h.bf16 %v2418_v56  ;;  %v3249_v29 = vunpack.i.l.bf16 %v2418_v56  ;;  %v1478_v53 = vpop.permute.xlu0 %1477  ;;  %v560_v18 = vpack.c.bf16 %v431_v27, %v430_v22  ;;  %v559_v19 = vpack.c.bf16 %v434_v26, %v433_v1 }
  0xd2   :  { %v1480_v17 = vunpack.i.h.bf16 %v1478_v53  ;;  %v1479_v20 = vunpack.i.l.bf16 %v1478_v53 }
  0xd3   :  { %661 = vmatprep.subr.bf16.mxu1 %v560_v18 }
  0xd4   :  { %662 = vmatpush1.bf16.msra.mxu1 %v559_v19  ;;  %v2434_v52 = vpop.permute.xlu1 %1492  ;;  %v484_v10 = vsel %vm474_vm8, %v1479_v20, %v3249_v29  ;;  %v485_v43 = vsel %vm474_vm8, %v1480_v17, %v3250_v15 }
  0xd5   :  { %v1495_v36 = vunpack.i.h.bf16 %v2434_v52  ;;  %v3252_v26 = vunpack.i.l.bf16 %v2434_v52  ;;  %v2446_v22 = vpop.permute.xlu0 %1487  ;;  %v566_v53 = vpack.c.bf16 %v485_v43, %v484_v10 }
  0xd6   :  { %v3256_v19 = vunpack.i.h.bf16 %v2446_v22  ;;  %v3254_v18 = vunpack.i.l.bf16 %v2446_v22 }
  0xd7   :  { %663 = vmatprep.subr.bf16.mxu1 %v566_v53  ;;  %v489_v27 = vsel %vm474_vm8, %v3252_v26, %v1495_v36 }
  0xd8   :  { %v1498_v1 = vpop.permute.xlu1 %1497  ;;  %v487_v29 = vsel %vm474_vm8, %v3254_v18, %v1479_v20  ;;  %v488_v10 = vsel %vm474_vm8, %v3256_v19, %v1480_v17  ;;  %v571_v26 = vpack.c.bf16 %v489_v27, %v489_v27 }
  0xd9   :  { %v1499_v43 = vunpack.i.l.bf16 %v1498_v1  ;;  %v2462_v15 = vpop.permute.xlu0 %454  ;;  %v565_v53 = vpack.c.bf16 %v488_v10, %v487_v29  ;;  %v1500_v18 = vunpack.i.h.bf16 %v1498_v1  ;;  %v496_v29 = vpack.c.bf16 %v2037_v40, %v2016_v33  ;;  %v2486_v33 = vld [vmem:[%s3210_s1] ss:$8 sps:$4 sm:$0xff]  }
  0xda   :  { %v486_v2 = vsel %vm474_vm8, %v1495_v36, %v2462_v15  ;;  %v579_v36 = vld [vmem:[%s3210_s1 + $0x10] sm:$0xff]  ;;  %v1375_v40 = vunpack.i.h.bf16 %v2196_v57  ;;  %s1858_s1 = smov 111  }
  0xdb   :  { %v572_v48 = vpack.c.bf16 %v486_v2, %v486_v2  ;;  %664 = vmatpush1.bf16.msra.mxu1 %v565_v53  ;;  %v90_v20 = vsel %vm89_vm1, %v1499_v43, %v1345_v8  ;;  %v622_v53 = vsel %vm620_vm9, %v571_v26, 0 }
  0xdc   :  { %v2471_v9 = vpop.permute.xlu1 %1507  ;;  %v503_v17 = vpack.c.bf16 %v90_v20, %v2018_v34  ;;  %v495_v34 = vpack.c.bf16 %v1901_v0, %v1909_v4  ;;  %v2494_v20 = vcombine.high %v579_v36, %v579_v36  ;;  %v3263_v0 = vunpack.i.l.bf16 %v2113_v3 }
  0xdd   :  { %v1510_v2 = vunpack.i.h.bf16 %v2471_v9  ;;  %v1509_v27 = vunpack.i.l.bf16 %v2471_v9  ;;  %v1503_v10 = vpop.permute.xlu0 %1502  ;;  %1262 = vmatprep.subr.msk.bf16.mxu1 %vm620_vm9, %v572_v48 }
  0xde   :  { %v1505_v8 = vunpack.i.h.bf16 %v1503_v10  ;;  %v1504_v1 = vunpack.i.l.bf16 %v1503_v10  ;;  %744 = vmatpush1.bf16.msra.mxu0 %v503_v17  ;;  %v106_v17 = vsel %vm89_vm1, %v1500_v18, %v1340_v60  ;;  %v3264_v60 = vunpack.i.h.bf16 %v2073_v47 }
  0xdf   :  { %666 = vmatpush1.bf16.msra.mxu1 %v622_v53  ;;  %v93_v48 = vsel %vm89_vm1, %v1510_v2, %v1499_v43 }
  0xe0   :  { %v2496_v26 = vpop.permute.xlu1 %1517  ;;  %690 = vmatprep.subr.bf16.mxu1 %v496_v29  ;;  %v107_v4 = vsel %vm89_vm1, %v1504_v1, %v3263_v0  ;;  %v502_v10 = vpack.c.bf16 %v93_v48, %v2039_v41  ;;  %v91_v43 = vsel %vm89_vm1, %v1505_v8, %v1500_v18  ;;  %v92_v44 = vsel %vm89_vm1, %v1509_v27, %v1504_v1 }
  0xe1   :  { %v1520_v53 = vunpack.i.h.bf16 %v2496_v26  ;;  %v1519_v19 = vunpack.i.l.bf16 %v2496_v26  ;;  %v1513_v29 = vpop.permute.xlu0 %1512  ;;  %v510_v9 = vpack.c.bf16 %v107_v4, %v106_v17  ;;  %v96_v3 = vsel %vm89_vm1, %v3264_v60, %v1510_v2 }
  0xe2   :  { %v1515_v0 = vunpack.i.h.bf16 %v1513_v29  ;;  %v1514_v62 = vunpack.i.l.bf16 %v1513_v29  ;;  %672 = vmatmul.mubr.bf16.vlgmr.msra.gmra.mrb[0].mxu1 %v2486_v33  ;;  %v509_v41 = vpack.c.bf16 %v92_v44, %v91_v43  ;;  %v3265_v18 = vunpack.i.l.bf16 %v2127_v14 }
  0xe3   :  { %691 = vmatpush1.bf16.msra.mxu1 %v495_v34  ;;  %745 = vmatprep.subr.bf16.mxu0 %v510_v9  ;;  %v3266_v26 = vunpack.i.l.bf16 %v2196_v57  ;;  %v3267_v1 = vunpack.i.h.bf16 %v2127_v14  ;;  %v501_v17 = vpack.c.bf16 %v96_v3, %v1911_v6  ;;  %v3270_v3 = vunpack.i.l.bf16 %v2082_v50 }
  0xe4   :  { %v160_v48 = vsel %vm144_vm2, %v1375_v40, %v3265_v18  ;;  %692 = vmatprep.subr.bf16.mxu1 %v502_v10  ;;  %746 = vmatpush1.bf16.msra.mxu0 %v509_v41  ;;  %v1528_v2 = vpop.permute.xlu1 %1527  ;;  %v145_v34 = vsel %vm144_vm2, %v1515_v0, %v1375_v40  ;;  %v146_v9 = vsel %vm144_vm2, %v1519_v19, %v1514_v62  ;;  %v3268_v41 = vunpack.i.l.bf16 %v2189_v54 }
  0xe5   :  { %v162_v47 = vsel %vm144_vm2, %v1520_v53, %v3266_v26  ;;  %v161_v44 = vsel %vm144_vm2, %v1514_v62, %v3267_v1  ;;  %v1523_v57 = vpop.permute.xlu0 %1522  ;;  %v515_v43 = vpack.c.bf16 %v146_v9, %v145_v34  ;;  %1264 = vmatprep.mubr.msk.bf16.mxu1 %vm613_vm0, %v2494_v20  ;;  %v2537_v10 = vcombine.low %v579_v36, %v579_v36 }
  0xe6   :  { %v516_v4 = vpack.c.bf16 %v161_v44, %v160_v48  ;;  %v1530_v14 = vunpack.i.h.bf16 %v1528_v2  ;;  %v1525_v29 = vunpack.i.h.bf16 %v1523_v57  ;;  %v1524_v60 = vunpack.i.l.bf16 %v1523_v57 }
  0xe7   :  { %v3269_v40 = vunpack.i.h.bf16 %v2230_v28  ;;  %v1529_v18 = vunpack.i.l.bf16 %v1528_v2  ;;  %693 = vmatpush1.bf16.msra.mxu1 %v501_v17  ;;  %v3271_v48 = vunpack.i.h.bf16 %v2071_v46  ;;  %v3272_v9 = vunpack.i.l.bf16 %v2139_v21 }
  0xe8   :  { %747 = vmatprep.subr.bf16.mxu0 %v516_v4  ;;  %v98_v36 = vsel %vm89_vm1, %v3270_v3, %v1525_v29  ;;  %v1538_v54 = vpop.permute.xlu1 %1537  ;;  %v94_v1 = vsel %vm89_vm1, %v1524_v60, %v1505_v8  ;;  %v95_v2 = vsel %vm89_vm1, %v1525_v29, %v1509_v27  ;;  %v3273_v4 = vunpack.i.h.bf16 %v2139_v21 }
  0xe9   :  { %v215_v62 = vsel %vm199_vm3, %v3269_v40, %v3268_v41  ;;  %v97_v26 = vsel %vm89_vm1, %v3271_v48, %v1524_v60  ;;  %748 = vmatpush1.bf16.msra.mxu0 %v515_v43  ;;  %v1533_v34 = vpop.permute.xlu0 %1532  ;;  %v508_v50 = vpack.c.bf16 %v95_v2, %v94_v1  ;;  %v151_v46 = vsel %vm144_vm2, %v3272_v9, %v1530_v14 }
  0xea   :  { %v522_v6 = vpack.c.bf16 %v215_v62, %v162_v47  ;;  %v507_v44 = vpack.c.bf16 %v98_v36, %v97_v26  ;;  %v1539_v47 = vunpack.i.l.bf16 %v1538_v54  ;;  %v1540_v17 = vunpack.i.h.bf16 %v1538_v54  ;;  %682 = vmatmul.mubr.bf16.gmra.mrb[4].mxu1 %v2537_v10 }
  0xeb   :  { %v1534_v57 = vunpack.i.l.bf16 %v1533_v34  ;;  %v1535_v27 = vunpack.i.h.bf16 %v1533_v34  ;;  %694 = vmatprep.subr.bf16.mxu1 %v508_v50  ;;  %v148_v43 = vsel %vm144_vm2, %v1530_v14, %v1515_v0  ;;  %v147_v62 = vsel %vm144_vm2, %v1529_v18, %v1520_v53  ;;  %1266 = vmatprep.mubr.msk.bf16.mxu1 %vm613_vm0, %v2007_v31 }
  0xec   :  { %749 = vmatprep.subr.bf16.mxu0 %v522_v6  ;;  %v152_v8 = vsel %vm144_vm2, %v3273_v4, %v1539_v47  ;;  %v149_v29 = vsel %vm144_vm2, %v1539_v47, %v1519_v19  ;;  %695 = vmatpush1.bf16.msra.mxu1 %v507_v44  ;;  %v1548_v41 = vpop.permute.xlu1 %1547  ;;  %v3274_v21 = vunpack.i.h.bf16 %v2230_v28  ;;  %v3275_v19 = vunpack.i.h.bf16 %v2174_v39 }
  0xed   :  { %v513_v60 = vpack.c.bf16 %v152_v8, %v151_v46  ;;  %v514_v40 = vpack.c.bf16 %v149_v29, %v148_v43  ;;  %v1550_v3 = vunpack.i.h.bf16 %v1548_v41  ;;  %v1549_v36 = vunpack.i.l.bf16 %v1548_v41  ;;  %v1543_v48 = vpop.permute.xlu0 %1542 }
  0xee   :  { %v200_v6 = vsel %vm199_vm3, %v1534_v57, %v3274_v21  ;;  %v153_v0 = vsel %vm144_vm2, %v3275_v19, %v1540_v17  ;;  %v1545_v14 = vunpack.i.h.bf16 %v1543_v48  ;;  %v1544_v54 = vunpack.i.l.bf16 %v1543_v48 }
  0xef   :  { %v521_v26 = vpack.c.bf16 %v200_v6, %v147_v62  ;;  %696 = vmatprep.subr.bf16.mxu1 %v514_v40  ;;  %v3276_v53 = vunpack.i.h.bf16 %v2161_v32  ;;  %v150_v2 = vsel %vm144_vm2, %v1540_v17, %v1529_v18  ;;  %v203_v31 = vsel %vm199_vm3, %v1550_v3, %v1534_v57 }
  0xf0   :  { %v3277_v39 = vunpack.i.h.bf16 %v2205_v63  ;;  %697 = vmatpush1.bf16.msra.mxu1 %v513_v60  ;;  %v1553_v34 = vpop.permute.xlu1 %1552  ;;  %v520_v50 = vpack.c.bf16 %v203_v31, %v150_v2  ;;  %v3278_v32 = vunpack.i.l.bf16 %v2230_v28  ;;  %v201_v18 = vsel %vm199_vm3, %v1545_v14, %v1535_v27 }
  0xf1   :  { %v206_v1 = vsel %vm199_vm3, %v3276_v53, %v1550_v3  ;;  %750 = vmatpush1.bf16.msra.mxu0 %v521_v26  ;;  %v1554_v46 = vunpack.i.l.bf16 %v1553_v34  ;;  %v249_v17 = vpop.permute.xlu0 %248  ;;  %v202_v4 = vsel %vm199_vm3, %v1549_v36, %v1544_v54  ;;  %v1555_v8 = vunpack.i.h.bf16 %v1553_v34 }
  0xf2   :  { %v216_v44 = vsel %vm199_vm3, %v1535_v27, %v3277_v39  ;;  %v519_v47 = vpack.c.bf16 %v206_v1, %v153_v0  ;;  %v217_v9 = vsel %vm199_vm3, %v1544_v54, %v3278_v32  ;;  %698 = vmatprep.subr.bf16.mxu1 %v520_v50  ;;  %v527_v43 = vpack.c.bf16 %v202_v4, %v201_v18 }
  0xf3   :  { %v528_v57 = vpack.c.bf16 %v217_v9, %v216_v44  ;;  %v2605_v29 = vsel %vm254_vm4, %v249_v17, %v2269_v55  ;;  %v3279_v28 = vunpack.i.l.bf16 %v2262_v49  ;;  %v256_v55 = vsel %vm254_vm4, %v1555_v8, %v1554_v46 }
  0xf4   :  { %699 = vmatpush1.bf16.msra.mxu1 %v519_v47  ;;  %v1558_v60 = vpop.permute.xlu1 %1557  ;;  %v3280_v49 = vunpack.i.h.bf16 %v2212_v5  ;;  %v3281_v48 = vunpack.i.l.bf16 %v2205_v63  ;;  %v3282_v63 = vunpack.i.h.bf16 %v2312_v61 }
  0xf5   :  { %751 = vmatprep.subr.bf16.mxu0 %v528_v57  ;;  %v271_v27 = vsel %vm254_vm4, %v1554_v46, %v3279_v28  ;;  %v1560_v40 = vunpack.i.h.bf16 %v1558_v60  ;;  %v1559_v62 = vunpack.i.l.bf16 %v1558_v60  ;;  %v243_v21 = vpop.permute.xlu0 %242  ;;  %v3284_v28 = vunpack.i.h.bf16 %v2250_v59 }
  0xf6   :  { %752 = vmatpush1.bf16.msra.mxu0 %v527_v43  ;;  %v534_v41 = vpack.c.bf16 %v271_v27, %v2605_v29  ;;  %v2614_v6 = vsel %vm254_vm4, %v243_v21, %v249_v17  ;;  %v3285_v59 = vunpack.i.h.bf16 %v2323_v42 }
  0xf7   :  { %v207_v3 = vsel %vm199_vm3, %v3280_v49, %v1559_v62  ;;  %v208_v26 = vsel %vm199_vm3, %v3281_v48, %v1560_v40  ;;  %v533_v19 = vpack.c.bf16 %v256_v55, %v2614_v6  ;;  %v204_v0 = vsel %vm199_vm3, %v1559_v62, %v1545_v14 }
  0xf8   :  { %753 = vmatprep.subr.bf16.mxu0 %v534_v41  ;;  %v525_v54 = vpack.c.bf16 %v208_v26, %v207_v3  ;;  %v1568_v53 = vpop.permute.xlu1 %1567  ;;  %v205_v1 = vsel %vm199_vm3, %v1560_v40, %v1549_v36  ;;  %v3283_v14 = vunpack.i.h.bf16 %v2296_v24  ;;  %v3286_v48 = vunpack.i.l.bf16 %v2296_v24 }
  0xf9   :  { %v1569_v2 = vunpack.i.l.bf16 %v1568_v53  ;;  %v1563_v5 = vpop.permute.xlu0 %1562  ;;  %v526_v31 = vpack.c.bf16 %v205_v1, %v204_v0  ;;  %v1570_v17 = vunpack.i.h.bf16 %v1568_v53  ;;  %v3287_v26 = vunpack.i.h.bf16 %v2285_v7 }
  0xfa   :  { %754 = vmatpush1.bf16.msra.mxu0 %v533_v19  ;;  %v1565_v39 = vunpack.i.h.bf16 %v1563_v5  ;;  %v1564_v44 = vunpack.i.l.bf16 %v1563_v5  ;;  %v3288_v24 = vunpack.i.l.bf16 %v2312_v61 }
  0xfb   :  { %700 = vmatprep.subr.bf16.mxu1 %v526_v31  ;;  %v310_v47 = vsel %vm309_vm5, %v1569_v2, %v3282_v63  ;;  %v326_v3 = vsel %vm309_vm5, %v1570_v17, %v3285_v59 }
  0xfc   :  { %701 = vmatpush1.bf16.msra.mxu1 %v525_v54  ;;  %v1573_v34 = vpop.permute.xlu1 %1572  ;;  %v272_v50 = vsel %vm254_vm4, %v1564_v44, %v3283_v14  ;;  %v257_v36 = vsel %vm254_vm4, %v1565_v39, %v1564_v44 }
  0xfd   :  { %v1574_v32 = vunpack.i.l.bf16 %v1573_v34  ;;  %v237_v9 = vpop.permute.xlu0 %236  ;;  %v540_v18 = vpack.c.bf16 %v2335_v23, %v272_v50  ;;  %v539_v46 = vpack.c.bf16 %v310_v47, %v257_v36  ;;  %v1575_v57 = vunpack.i.h.bf16 %v1573_v34 }
  0xfe   :  { %v2644_v4 = vsel %vm254_vm4, %v237_v9, %v243_v21  ;;  %v2649_v43 = vsel %vm254_vm4, %v2239_v12, %v237_v9  ;;  %v3289_v36 = vunpack.i.l.bf16 %v2364_v11  ;;  %v3290_v9 = vunpack.i.h.bf16 %v2364_v11 }
  0xff   :  { %v262_v27 = vsel %vm254_vm4, %v3284_v28, %v1574_v32  ;;  %755 = vmatprep.subr.bf16.mxu0 %v540_v18  ;;  %v259_v23 = vsel %vm254_vm4, %v1574_v32, %v1555_v8  ;;  %v263_v8 = vsel %vm254_vm4, %v3286_v48, %v1575_v57  ;;  %v260_v0 = vsel %vm254_vm4, %v1575_v57, %v1565_v39 }
 0x100   :  { %v531_v60 = vpack.c.bf16 %v262_v27, %v2649_v43  ;;  %756 = vmatpush1.bf16.msra.mxu0 %v539_v46  ;;  %v1583_v41 = vpop.permute.xlu1 %1582  ;;  %v532_v40 = vpack.c.bf16 %v259_v23, %v2644_v4 }
 0x101   :  { %v1585_v62 = vunpack.i.h.bf16 %v1583_v41  ;;  %v1584_v21 = vunpack.i.l.bf16 %v1583_v41  ;;  %v1578_v55 = vpop.permute.xlu0 %1577 }
 0x102   :  { %v1580_v12 = vunpack.i.h.bf16 %v1578_v55  ;;  %v1579_v49 = vunpack.i.l.bf16 %v1578_v55  ;;  %702 = vmatprep.subr.bf16.mxu1 %v532_v40  ;;  %v3292_v55 = vunpack.i.l.bf16 %v2323_v42 }
 0x103   :  { %v316_v19 = vsel %vm309_vm5, %v3287_v26, %v1585_v62  ;;  %703 = vmatpush1.bf16.msra.mxu1 %v531_v60  ;;  %v313_v54 = vsel %vm309_vm5, %v1585_v62, %v1569_v2  ;;  %v3291_v62 = vunpack.i.h.bf16 %v2305_v35 }
 0x104   :  { %v537_v53 = vpack.c.bf16 %v316_v19, %v263_v8  ;;  %v1593_v1 = vpop.permute.xlu1 %1592  ;;  %v538_v5 = vpack.c.bf16 %v313_v54, %v260_v0  ;;  %v327_v31 = vsel %vm309_vm5, %v1579_v49, %v3288_v24  ;;  %v311_v7 = vsel %vm309_vm5, %v1580_v12, %v1570_v17 }
 0x105   :  { %v1595_v44 = vunpack.i.h.bf16 %v1593_v1  ;;  %v1594_v63 = vunpack.i.l.bf16 %v1593_v1  ;;  %v1588_v47 = vpop.permute.xlu0 %1587  ;;  %v546_v34 = vpack.c.bf16 %v327_v31, %v326_v3  ;;  %v312_v39 = vsel %vm309_vm5, %v1584_v21, %v1579_v49 }
 0x106   :  { %v1590_v14 = vunpack.i.h.bf16 %v1588_v47  ;;  %v1589_v2 = vunpack.i.l.bf16 %v1588_v47  ;;  %704 = vmatprep.subr.bf16.mxu1 %v538_v5  ;;  %v545_v50 = vpack.c.bf16 %v312_v39, %v311_v7  ;;  %v3293_v5 = vunpack.i.l.bf16 %v2337_v38 }
 0x107   :  { %757 = vmatprep.subr.bf16.mxu0 %v546_v34  ;;  %705 = vmatpush1.bf16.msra.mxu1 %v537_v53  ;;  %v3295_v39 = vunpack.i.l.bf16 %v2395_v58  ;;  %v3296_v58 = vunpack.i.h.bf16 %v2409_v25 }
 0x108   :  { %758 = vmatpush1.bf16.msra.mxu0 %v545_v50  ;;  %v1603_v61 = vpop.permute.xlu1 %1602  ;;  %v380_v32 = vsel %vm364_vm6, %v1589_v2, %v3289_v36  ;;  %v381_v18 = vsel %vm364_vm6, %v1590_v14, %v3290_v9  ;;  %v365_v46 = vsel %vm364_vm6, %v1594_v63, %v1589_v2  ;;  %v366_v17 = vsel %vm364_vm6, %v1595_v44, %v1590_v14 }
 0x109   :  { %v1598_v57 = vpop.permute.xlu0 %1597  ;;  %v552_v28 = vpack.c.bf16 %v381_v18, %v380_v32  ;;  %v551_v27 = vpack.c.bf16 %v366_v17, %v365_v46  ;;  %v1605_v23 = vunpack.i.h.bf16 %v1603_v61  ;;  %v1604_v60 = vunpack.i.l.bf16 %v1603_v61 }
 0x10a   :  { %v1600_v41 = vunpack.i.h.bf16 %v1598_v57  ;;  %v1599_v40 = vunpack.i.l.bf16 %v1598_v57 }
 0x10b   :  { %759 = vmatprep.subr.bf16.mxu0 %v552_v28  ;;  %v382_v42 = vsel %vm364_vm6, %v1604_v60, %v2370_v16  ;;  %v367_v1 = vsel %vm364_vm6, %v1605_v23, %v1604_v60 }
 0x10c   :  { %v317_v11 = vsel %vm309_vm5, %v3291_v62, %v1599_v40  ;;  %v318_v49 = vsel %vm309_vm5, %v3292_v55, %v1600_v41  ;;  %760 = vmatpush1.bf16.msra.mxu0 %v551_v27  ;;  %v1613_v59 = vpop.permute.xlu1 %1612  ;;  %v314_v3 = vsel %vm309_vm5, %v1599_v40, %v1580_v12  ;;  %v315_v48 = vsel %vm309_vm5, %v1600_v41, %v1584_v21 }
 0x10d   :  { %v543_v8 = vpack.c.bf16 %v318_v49, %v317_v11  ;;  %v1615_v26 = vunpack.i.h.bf16 %v1613_v59  ;;  %v1614_v19 = vunpack.i.l.bf16 %v1613_v59  ;;  %v1608_v35 = vpop.permute.xlu0 %1607  ;;  %v544_v0 = vpack.c.bf16 %v315_v48, %v314_v3 }
 0x10e   :  { %v1610_v54 = vunpack.i.h.bf16 %v1608_v35  ;;  %v1609_v53 = vunpack.i.l.bf16 %v1608_v35  ;;  %v3294_v21 = vunpack.i.h.bf16 %v2337_v38  ;;  %v3297_v62 = vunpack.i.h.bf16 %v2354_v37 }
 0x10f   :  { %v371_v12 = vsel %vm364_vm6, %v3293_v5, %v1614_v19  ;;  %706 = vmatprep.subr.bf16.mxu1 %v544_v0  ;;  %v368_v31 = vsel %vm364_vm6, %v1614_v19, %v1594_v63  ;;  %v369_v16 = vsel %vm364_vm6, %v1615_v26, %v1595_v44  ;;  %v3298_v55 = vunpack.i.h.bf16 %v2380_v13 }
 0x110   :  { %v372_v24 = vsel %vm364_vm6, %v3294_v21, %v1615_v26  ;;  %707 = vmatpush1.bf16.msra.mxu1 %v543_v8  ;;  %v1623_v47 = vpop.permute.xlu1 %1622  ;;  %v550_v34 = vpack.c.bf16 %v369_v16, %v368_v31  ;;  %v435_v14 = vsel %vm419_vm7, %v1609_v53, %v3295_v39  ;;  %v420_v38 = vsel %vm419_vm7, %v1610_v54, %v1609_v53 }
 0x111   :  { %v549_v7 = vpack.c.bf16 %v372_v24, %v371_v12  ;;  %v1625_v2 = vunpack.i.h.bf16 %v1623_v47  ;;  %v1624_v50 = vunpack.i.l.bf16 %v1623_v47  ;;  %v1618_v61 = vpop.permute.xlu0 %1617  ;;  %v558_v36 = vpack.c.bf16 %v435_v14, %v382_v42 }
 0x112   :  { %v557_v63 = vpack.c.bf16 %v420_v38, %v367_v1  ;;  %v1620_v32 = vunpack.i.h.bf16 %v1618_v61  ;;  %v1619_v9 = vunpack.i.l.bf16 %v1618_v61  ;;  %708 = vmatprep.subr.bf16.mxu1 %v550_v34  ;;  %v3300_v53 = vunpack.i.h.bf16 %v2446_v22 }
 0x113   :  { %761 = vmatprep.subr.bf16.mxu0 %v558_v36  ;;  %v3301_v47 = vunpack.i.h.bf16 %v2385_v51  ;;  %v3302_v39 = vunpack.i.l.bf16 %v2409_v25  ;;  %v3303_v38 = vunpack.i.l.bf16 %v2434_v52 }
 0x114   :  { %709 = vmatpush1.bf16.msra.mxu1 %v549_v7  ;;  %762 = vmatpush1.bf16.msra.mxu0 %v557_v63  ;;  %v1628_v44 = vpop.permute.xlu1 %1627  ;;  %v436_v18 = vsel %vm419_vm7, %v1619_v9, %v3296_v58  ;;  %v437_v46 = vsel %vm419_vm7, %v1620_v32, %v2403_v30  ;;  %v421_v17 = vsel %vm419_vm7, %v1624_v50, %v1619_v9 }
 0x115   :  { %v1629_v57 = vunpack.i.l.bf16 %v1628_v44  ;;  %v351_v28 = vpop.permute.xlu0 %350  ;;  %v564_v27 = vpack.c.bf16 %v437_v46, %v436_v18  ;;  %v422_v60 = vsel %vm419_vm7, %v1625_v2, %v1620_v32  ;;  %v1630_v37 = vunpack.i.h.bf16 %v1628_v44 }
 0x116   :  { %v563_v41 = vpack.c.bf16 %v422_v60, %v421_v17  ;;  %v370_v40 = vsel %vm364_vm6, %v351_v28, %v1605_v23  ;;  %v373_v11 = vsel %vm364_vm6, %v3297_v62, %v351_v28  ;;  %v3304_v46 = vunpack.i.h.bf16 %v2418_v56 }
 0x117   :  { %v423_v30 = vsel %vm419_vm7, %v1629_v57, %v1610_v54  ;;  %v426_v49 = vsel %vm419_vm7, %v3298_v55, %v1629_v57  ;;  %763 = vmatprep.subr.bf16.mxu0 %v564_v27  ;;  %v3299_v54 = vunpack.i.l.bf16 %v2446_v22  ;;  %v424_v7 = vsel %vm419_vm7, %v1630_v37, %v1624_v50 }
 0x118   :  { %v555_v59 = vpack.c.bf16 %v426_v49, %v373_v11  ;;  %v556_v3 = vpack.c.bf16 %v423_v30, %v370_v40  ;;  %764 = vmatpush1.bf16.msra.mxu0 %v563_v41  ;;  %v1638_v48 = vpop.permute.xlu1 %1637  ;;  %v427_v22 = vsel %vm419_vm7, %v3301_v47, %v1630_v37  ;;  %v3305_v57 = vunpack.i.l.bf16 %v2418_v56 }
 0x119   :  { %v1640_v8 = vunpack.i.h.bf16 %v1638_v48  ;;  %v1639_v23 = vunpack.i.l.bf16 %v1638_v48  ;;  %v1633_v26 = vpop.permute.xlu0 %1632  ;;  %v3306_v11 = vmov 0  }
 0x11a   :  { %v1635_v19 = vunpack.i.h.bf16 %v1633_v26  ;;  %v1634_v35 = vunpack.i.l.bf16 %v1633_v26  ;;  %710 = vmatprep.subr.bf16.mxu1 %v556_v3 }
 0x11b   :  { %711 = vmatpush1.bf16.msra.mxu1 %v555_v59 }
 0x11c   :  { %v1643_v0 = vpop.permute.xlu1 %1642  ;;  %v490_v13 = vsel %vm474_vm8, %v1634_v35, %v3299_v54  ;;  %v491_v42 = vsel %vm474_vm8, %v1635_v19, %v3300_v53  ;;  %v475_v1 = vsel %vm474_vm8, %v1639_v23, %v1634_v35  ;;  %v476_v5 = vsel %vm474_vm8, %v1640_v8, %v1635_v19 }
 0x11d   :  { %v1645_v12 = vunpack.i.h.bf16 %v1643_v0  ;;  %v1644_v21 = vunpack.i.l.bf16 %v1643_v0  ;;  %v406_v24 = vpop.permute.xlu0 %405  ;;  %v570_v31 = vpack.c.bf16 %v491_v42, %v490_v13  ;;  %v569_v16 = vpack.c.bf16 %v476_v5, %v475_v1  ;;  %v3307_v42 = vld [vmem:[#allocation9_spill] sm:$0xff]  ;;  %v3308_v5 = vld [vmem:[#allocation8_spill] sm:$0xff] }
 0x11e   :  { %v425_v34 = vsel %vm419_vm7, %v406_v24, %v1625_v2  ;;  %v428_v14 = vsel %vm419_vm7, %v3302_v39, %v406_v24 }
 0x11f   :  { %v492_v61 = vsel %vm474_vm8, %v1645_v12, %v3303_v38  ;;  %v561_v36 = vpack.c.bf16 %v428_v14, %v427_v22  ;;  %v562_v50 = vpack.c.bf16 %v425_v34, %v424_v7  ;;  %765 = vmatprep.subr.bf16.mxu0 %v570_v31  ;;  %v477_v51 = vsel %vm474_vm8, %v1644_v21, %v1645_v12 }
 0x120   :  { %v576_v63 = vpack.c.bf16 %v492_v61, %v492_v61  ;;  %766 = vmatpush1.bf16.msra.mxu0 %v569_v16  ;;  %v461_v32 = vpop.permute.xlu1 %460  ;;  %v575_v2 = vpack.c.bf16 %v477_v51, %v477_v51 }
 0x121   :  { %v1648_v9 = vpop.permute.xlu0 %1647  ;;  %712 = vmatprep.subr.bf16.mxu1 %v562_v50  ;;  %v480_v52 = vsel %vm474_vm8, %v461_v32, %v1644_v21  ;;  %v483_v58 = vsel %vm474_vm8, %v2462_v15, %v461_v32 }
 0x122   :  { %v1650_v25 = vunpack.i.h.bf16 %v1648_v9  ;;  %v1649_v44 = vunpack.i.l.bf16 %v1648_v9  ;;  %713 = vmatpush1.bf16.msra.mxu1 %v561_v36  ;;  %1268 = vmatprep.subr.msk.bf16.mxu0 %vm620_vm9, %v576_v63  ;;  %v634_v18 = vsel %vm620_vm9, %v575_v2, 0  ;;  %v573_v40 = vpack.c.bf16 %v483_v58, %v483_v58 }
 0x123   :  { %v574_v62 = vpack.c.bf16 %v480_v52, %v480_v52 }
 0x124   :  { %v482_v17 = vsel %vm474_vm8, %v3304_v46, %v1650_v25  ;;  %v481_v28 = vsel %vm474_vm8, %v3305_v57, %v1649_v44  ;;  %768 = vmatpush1.bf16.msra.mxu0 %v634_v18  ;;  %v478_v27 = vsel %vm474_vm8, %v1649_v44, %v1639_v23  ;;  %v479_v60 = vsel %vm474_vm8, %v1650_v25, %v1640_v8 }
 0x125   :  { %v567_v15 = vpack.c.bf16 %v482_v17, %v481_v28  ;;  %v568_v41 = vpack.c.bf16 %v479_v60, %v478_v27  ;;  %v628_v56 = vsel %vm620_vm9, %v573_v40, 0 }
 0x127   :  { %714 = vmatprep.subr.bf16.mxu1 %v568_v41  ;;  %774 = vmatmul.mubr.bf16.vlgmr.msra.gmra.mrb[0].mxu0 %v2486_v33 }
 0x128   :  { %715 = vmatpush1.bf16.msra.mxu1 %v567_v15  ;;  %1270 = vmatprep.mubr.msk.bf16.mxu0 %vm613_vm0, %v2494_v20 }
 0x129   :  { %1265 = vmatprep.subr.msk.bf16.mxu1 %vm620_vm9, %v574_v62 }
 0x12c   :  { %717 = vmatpush1.bf16.msra.mxu1 %v628_v56 }
 0x12f   :  { %723 = vmatmul.mubr.bf16.vlgmr.msra.gmra.mrb[8].mxu1 %v2486_v33  ;;  %784 = vmatmul.mubr.bf16.gmra.mrb[4].mxu0 %v2537_v10 }
 0x130   :  { %1104 = vmatprep.mubr.bf16.mxu0 %v3306_v11  ;;  %1267 = vmatprep.mubr.msk.bf16.mxu1 %vm613_vm0, %v2494_v20 }
 0x132   :  { %v591_v55 = vpop.permute.xlu0 %590 }
 0x137   :  { %733 = vmatmul.mubr.bf16.gmra.mrb[12].mxu1 %v2537_v10 }
 0x1b5   :  { %v2813_v30 = vpop.f32.mrb[0].mxu1 }
 0x1b6   :  { %v2815_v49 = vpop.f32.mrb[1].mxu1 }
 0x1b7   :  { %v677_v59 = vpop.f32.mrb[2].mxu1 }
 0x1b8   :  { %v678_v3 = vadd.f32 %v677_v59, %v591_v55  ;;  %v679_v48 = vpop.f32.mrb[3].mxu1 }
 0x1b9   :  { %v680_v8 = vadd.f32 %v679_v48, %v591_v55 }
 0x1ba   :  { %v1277_v23 = vmul.f32 -1.442695, %v678_v3 }
 0x1bb   :  { %v1278_v33 = vmul.f32 -1.442695, %v680_v8 }
 0x1bc   :  { %1738 = vpow2.f32 %v1277_v23 }
 0x1bd   :  { %1740 = vpow2.f32 %v1278_v33  ;;  %v2817_v26 = vpop.f32.mrb[4].mxu1 }
 0x1be   :  { %v2819_v37 = vpop.f32.mrb[5].mxu1 }
 0x1bf   :  { %v687_v20 = vpop.f32.mrb[6].mxu1 }
 0x1c0   :  { %v688_v19 = vpop.f32.mrb[7].mxu1 }
 0x1c1   :  { %v580_v19 = vld [vmem:[%s3212_s3] sm:$0xff] }
 0x1c6   :  { %v1739_v10 = vpop.eup %1738 }
 0x1c7   :  { %v1741_v35 = vpop.eup %1740  ;;  %v846_v0 = vadd.f32 1.0, %v1739_v10  ;;  %v582_v10 = vld [vmem:[%s3212_s3 + $0x10] sm:$0xff] }
 0x1c8   :  { %v847_v54 = vadd.f32 1.0, %v1741_v35 }
 0x1c9   :  { %1742 = vrcp.f32 %v846_v0 }
 0x1ca   :  { %1744 = vrcp.f32 %v847_v54 }
 0x1d3   :  { %v1743_v13 = vpop.eup %1742 }
 0x1d4   :  { %v1745_v53 = vpop.eup %1744  ;;  %v2822_v1 = vmul.f32 %v1743_v13, %v3307_v42 }
 0x1d5   :  { %v2825_v12 = vmul.f32 %v1745_v53, %v3308_v5 }
 0x1d6   :  { %964 = vrot.lane.b32.xlu0 %v2822_v1, %s1858_s1  ;;  %946 = vrot.lane.b32.xlu1 %v2822_v1, %s1849_s0 }
 0x1d7   :  { %v1652_v21 = vpack.i.bf16 %v2825_v12, %v2822_v1 }
 0x1da   :  { %1653 = vrot.lane.b32.xlu1 %v1652_v21, %s1859_s18 }
 0x1de   :  { %1658 = vrot.lane.b32.xlu1 %v1652_v21, %s1860_s19 }
 0x1fa   :  { %v2835_v24 = vpop.f32.mrb[0].mxu0 }
 0x1fb   :  { %v2837_v31 = vpop.f32.mrb[1].mxu0 }
 0x1fc   :  { %v779_v16 = vpop.f32.mrb[2].mxu0 }
 0x1fd   :  { %v781_v7 = vpop.f32.mrb[3].mxu0  ;;  %v780_v2 = vadd.f32 %v779_v16, %v591_v55 }
 0x1fe   :  { %v782_v47 = vadd.f32 %v781_v7, %v591_v55 }
 0x1ff   :  { %v1281_v44 = vmul.f32 -1.442695, %v780_v2 }
 0x200   :  { %v1282_v22 = vmul.f32 -1.442695, %v782_v47 }
 0x202   :  { %1746 = vpow2.f32 %v1282_v22  ;;  %v2839_v34 = vpop.f32.mrb[8].mxu1 }
 0x203   :  { %v2841_v39 = vpop.f32.mrb[9].mxu1 }
 0x204   :  { %v728_v14 = vpop.f32.mrb[10].mxu1 }
 0x205   :  { %v729_v38 = vadd.f32 %v728_v14, %v591_v55  ;;  %v730_v61 = vpop.f32.mrb[11].mxu1 }
 0x206   :  { %v731_v50 = vadd.f32 %v730_v61, %v591_v55 }
 0x207   :  { %v1279_v36 = vmul.f32 -1.442695, %v729_v38 }
 0x208   :  { %v1280_v63 = vmul.f32 -1.442695, %v731_v50 }
 0x209   :  { %1748 = vpow2.f32 %v1279_v36 }
 0x20c   :  { %v1747_v51 = vpop.eup %1746 }
 0x20d   :  { %v851_v32 = vadd.f32 1.0, %v1747_v51 }
 0x20f   :  { %1750 = vrcp.f32 %v851_v32 }
 0x210   :  { %1752 = vpow2.f32 %v1280_v63 }
 0x213   :  { %v1749_v9 = vpop.eup %1748 }
 0x214   :  { %v848_v25 = vadd.f32 1.0, %v1749_v9 }
 0x216   :  { %1754 = vrcp.f32 %v848_v25 }
 0x217   :  { %1756 = vpow2.f32 %v1281_v44 }
 0x219   :  { %v1751_v52 = vpop.eup %1750 }
 0x21a   :  { %v1753_v58 = vpop.eup %1752  ;;  %v2844_v18 = vmul.f32 %v1751_v52, %v2605_v29 }
 0x21b   :  { %v849_v46 = vadd.f32 1.0, %v1753_v58 }
 0x21c   :  { %880 = vrot.lane.b32.xlu0 %v2844_v18, %s1859_s18  ;;  %899 = vrot.lane.b32.xlu1 %v2844_v18, %s1860_s19 }
 0x21d   :  { %1758 = vrcp.f32 %v849_v46 }
 0x220   :  { %v1755_v17 = vpop.eup %1754  ;;  %1663 = vrot.lane.b32.xlu0 %v1652_v21, %s1861_s20  ;;  %1668 = vrot.lane.b32.xlu1 %v1652_v21, %s1862_s21 }
 0x221   :  { %v2853_v57 = vmul.f32 %v1755_v17, %v2649_v43  ;;  %v1757_v28 = vpop.eup %1756 }
 0x222   :  { %v850_v60 = vadd.f32 1.0, %v1757_v28 }
 0x223   :  { %v1672_v27 = vpack.i.bf16 %v2853_v57, %v2825_v12 }
 0x224   :  { %918 = vrot.lane.b32.xlu0 %v2844_v18, %s1861_s20  ;;  %937 = vrot.lane.b32.xlu1 %v2844_v18, %s1862_s21  ;;  %1760 = vrcp.f32 %v850_v60 }
 0x227   :  { %v1759_v15 = vpop.eup %1758 }
 0x228   :  { %1673 = vrot.lane.b32.xlu0 %v1672_v27, %s1849_s0  ;;  %983 = vrot.lane.b32.xlu1 %v2822_v1, %s1851_s30  ;;  %v2867_v41 = vmul.f32 %v1759_v15, %v2644_v4 }
 0x22a   :  { %v1692_v40 = vpack.i.bf16 %v2867_v41, %v2853_v57 }
 0x22c   :  { %1678 = vrot.lane.b32.xlu0 %v1672_v27, %s1858_s1  ;;  %1688 = vrot.lane.b32.xlu1 %v1672_v27, %s1851_s30 }
 0x22e   :  { %v1761_v62 = vpop.eup %1760 }
 0x22f   :  { %v2877_v56 = vmul.f32 %v1761_v62, %v2614_v6 }
 0x230   :  { %1683 = vrot.lane.b32.xlu0 %v1652_v21, %s1852_s5  ;;  %1005 = vrot.lane.b32.xlu1 %v2853_v57, %s1852_s5 }
 0x231   :  { %v1712_v55 = vpack.i.bf16 %v2877_v56, %v2867_v41 }
 0x234   :  { %1693 = vrot.lane.b32.xlu0 %v1692_v40, %s1859_s18  ;;  %1698 = vrot.lane.b32.xlu1 %v1692_v40, %s1860_s19 }
 0x238   :  { %1703 = vrot.lane.b32.xlu0 %v1692_v40, %s1861_s20  ;;  %1708 = vrot.lane.b32.xlu1 %v1692_v40, %s1862_s21 }
 0x23c   :  { %1713 = vrot.lane.b32.xlu0 %v1712_v55, %s1849_s0  ;;  %1718 = vrot.lane.b32.xlu1 %v1712_v55, %s1858_s1 }
 0x240   :  { %1723 = vrot.lane.b32.xlu0 %v1712_v55, %s1851_s30  ;;  %1728 = vrot.lane.b32.xlu1 %v1712_v55, %s1852_s5 }
 0x244   :  { %878 = vrot.lane.b32.xlu0 %v2877_v56, %s1859_s18  ;;  %897 = vrot.lane.b32.xlu1 %v2877_v56, %s1860_s19 }
 0x248   :  { %916 = vrot.lane.b32.xlu0 %v2877_v56, %s1861_s20  ;;  %935 = vrot.lane.b32.xlu1 %v2877_v56, %s1862_s21  ;;  %v2895_v59 = vpop.permute.xlu1 %946  ;;  %v2929_v13 = vpop.permute.xlu0 %964 }
 0x24c   :  { %956 = vrot.lane.b32.xlu0 %v2844_v18, %s1849_s0  ;;  %974 = vrot.lane.b32.xlu1 %v2844_v18, %s1858_s1  ;;  %v2901_v3 = vpop.permute.xlu1 %1653 }
 0x24d   :  { %v1656_v48 = vunpack.i.h.bf16 %v2901_v3  ;;  %v1655_v8 = vunpack.i.l.bf16 %v2901_v3 }
 0x24f   :  { %v887_v35 = vsel %vm882_vm10, %v1655_v8, %v1656_v48 }
 0x250   :  { %993 = vrot.lane.b32.xlu0 %v2844_v18, %s1851_s30  ;;  %1011 = vrot.lane.b32.xlu1 %v2844_v18, %s1852_s5  ;;  %v2909_v23 = vpop.permute.xlu1 %1658 }
 0x251   :  { %v1661_v33 = vunpack.i.h.bf16 %v2909_v23  ;;  %v1660_v20 = vunpack.i.l.bf16 %v2909_v23 }
 0x253   :  { %v906_v0 = vsel %vm901_vm11, %v1660_v20, %v1661_v33 }
 0x254   :  { %585 = vperm.xlu0 %1651, %v580_v19   ;;  %595 = vperm.xlu1 %1732, %v582_v10   ;;  %v1020_v54 = vpack.c.bf16 %v906_v0, %v887_v35 }
 0x256   :  { %1072 = vmatprep.subr.bf16.mxu0 %v1020_v54 }
 0x28e   :  { %v2931_v53 = vpop.permute.xlu0 %880  ;;  %v2933_v21 = vpop.permute.xlu1 %899 }
 0x28f   :  { %v888_v16 = vsel %vm882_vm10, %v2931_v53, %v1655_v8  ;;  %v907_v7 = vsel %vm901_vm11, %v2933_v21, %v1660_v20 }
 0x290   :  { %v1019_v47 = vpack.c.bf16 %v907_v7, %v888_v16 }
 0x292   :  { %v2941_v22 = vpop.permute.xlu0 %1663  ;;  %v2943_v14 = vpop.permute.xlu1 %1668  ;;  %1073 = vmatpush1.bf16.msra.mxu0 %v1019_v47 }
 0x293   :  { %v1666_v38 = vunpack.i.h.bf16 %v2941_v22  ;;  %v1665_v61 = vunpack.i.l.bf16 %v2941_v22  ;;  %v1671_v36 = vunpack.i.h.bf16 %v2943_v14  ;;  %v1670_v50 = vunpack.i.l.bf16 %v2943_v14 }
 0x295   :  { %v925_v51 = vsel %vm920_vm12, %v1665_v61, %v1666_v38  ;;  %v944_v63 = vsel %vm939_vm13, %v1670_v50, %v1671_v36 }
 0x296   :  { %v2959_v32 = vpop.permute.xlu0 %918  ;;  %v2961_v2 = vpop.permute.xlu1 %937  ;;  %v1026_v9 = vpack.c.bf16 %v944_v63, %v925_v51 }
 0x297   :  { %v926_v25 = vsel %vm920_vm12, %v2959_v32, %v1665_v61  ;;  %v945_v44 = vsel %vm939_vm13, %v2961_v2, %v1670_v50 }
 0x298   :  { %v1025_v52 = vpack.c.bf16 %v945_v44, %v926_v25  ;;  %1074 = vmatprep.subr.bf16.mxu0 %v1026_v9 }
 0x29a   :  { %v2969_v58 = vpop.permute.xlu0 %1673  ;;  %v2971_v46 = vpop.permute.xlu1 %983  ;;  %1075 = vmatpush1.bf16.msra.mxu0 %v1025_v52 }
 0x29b   :  { %v1676_v17 = vunpack.i.h.bf16 %v2969_v58  ;;  %v1675_v28 = vunpack.i.l.bf16 %v2969_v58 }
 0x29d   :  { %v962_v27 = vsel %vm89_vm1, %v2895_v59, %v1675_v28  ;;  %v961_v60 = vsel %vm89_vm1, %v1675_v28, %v1676_v17 }
 0x29e   :  { %v1031_v15 = vpack.c.bf16 %v962_v27, %v2822_v1  ;;  %v2984_v40 = vpop.permute.xlu0 %1678  ;;  %v2986_v62 = vpop.permute.xlu1 %1688  ;;  %v1032_v55 = vpack.c.bf16 %v961_v60, %v2825_v12 }
 0x29f   :  { %v1681_v8 = vunpack.i.h.bf16 %v2984_v40  ;;  %v1680_v20 = vunpack.i.l.bf16 %v2984_v40  ;;  %v1691_v19 = vunpack.i.h.bf16 %v2986_v62  ;;  %v1690_v10 = vunpack.i.l.bf16 %v2986_v62 }
 0x2a0   :  { %1076 = vmatprep.subr.bf16.mxu0 %v1032_v55 }
 0x2a1   :  { %v981_v1 = vsel %vm976_vm14, %v2929_v13, %v1680_v20  ;;  %v999_v35 = vsel %vm199_vm3, %v2971_v46, %v1690_v10  ;;  %1077 = vmatpush1.bf16.msra.mxu0 %v1031_v15  ;;  %v980_v12 = vsel %vm976_vm14, %v1680_v20, %v1681_v8  ;;  %v998_v0 = vsel %vm199_vm3, %v1690_v10, %v1691_v19 }
 0x2a2   :  { %v1037_v54 = vpack.c.bf16 %v999_v35, %v981_v1  ;;  %v3007_v16 = vpop.permute.xlu0 %1683  ;;  %v3009_v7 = vpop.permute.xlu1 %1005  ;;  %v1038_v47 = vpack.c.bf16 %v998_v0, %v980_v12  ;;  %v3041_v1 = vld [vmem:[%s3211_s2] sm:$0xf]  ;;  %s1863_s2 = smov [#allocation5]  }
 0x2a3   :  { %v1686_v61 = vunpack.i.h.bf16 %v3007_v16  ;;  %v1685_v50 = vunpack.i.l.bf16 %v3007_v16  ;;  %v734_v16 = vpop.f32.mrb[12].mxu1  ;;  %s1249_s27 = sshll.u32 %s1863_s2, 4  ;;  %s1250_s27 = int_to_ptr.vmem [resolvable:$true] %s1249_s27 }
 0x2a4   :  { %1078 = vmatprep.subr.bf16.mxu0 %v1038_v47  ;;  %s1820_s28 = scalar_lea.vmem %s1250_s27, 768  ;;  %p1825_p9 = scmp.lt.s32.totalorder %s1250_s27, %s1250_s27 }
 0x2a5   :  { %v1016_v51 = vsel %vm254_vm4, %v1686_v61, %v3009_v7  ;;  %1079 = vmatpush1.bf16.msra.mxu0 %v1037_v54  ;;  %v1017_v63 = vsel %vm254_vm4, %v1685_v50, %v1686_v61  ;;  %p1821_p8 = scmp.ne.s32.totalorder %s1250_s27, %s1820_s28  ;;  %p1826_p10 = scmp.lt.s32.totalorder %s1820_s28, %s1820_s28 }
 0x2a6   :  { %v1044_v9 = vpack.c.bf16 %v1016_v51, %v1016_v51  ;;  %v3020_v25 = vpop.permute.xlu0 %1693  ;;  %v3022_v44 = vpop.permute.xlu1 %1698  ;;  %v1043_v52 = vpack.c.bf16 %v1017_v63, %v1017_v63 }
 0x2a7   :  { %v1696_v28 = vunpack.i.h.bf16 %v3020_v25  ;;  %v1695_v27 = vunpack.i.l.bf16 %v3020_v25  ;;  %v1701_v60 = vunpack.i.h.bf16 %v3022_v44  ;;  %v1700_v15 = vunpack.i.l.bf16 %v3022_v44  ;;  %p1827_p11 = por %p1826_p10, %p1825_p9 }
 0x2a8   :  { %1283 = vmatprep.subr.msk.bf16.mxu0 %vm620_vm9, %v1044_v9  ;;  %v1055_v55 = vsel %vm620_vm9, %v1043_v52, 0 }
 0x2a9   :  { %v886_v20 = vsel %vm882_vm10, %v1656_v48, %v1695_v27  ;;  %v905_v10 = vsel %vm901_vm11, %v1661_v33, %v1700_v15  ;;  %1081 = vmatpush1.bf16.msra.mxu0 %v1055_v55  ;;  %v885_v35 = vsel %vm882_vm10, %v1695_v27, %v1696_v28  ;;  %v904_v3 = vsel %vm901_vm11, %v1700_v15, %v1701_v60  ;;  %p1828_p12 = pnand %p1827_p11, %p1821_p8 }
 0x2aa   :  { %v1021_v48 = vpack.c.bf16 %v905_v10, %v886_v20  ;;  %v3051_v23 = vpop.permute.xlu0 %1703  ;;  %v3053_v33 = vpop.permute.xlu1 %1708  ;;  %v1022_v12 = vpack.c.bf16 %v904_v3, %v885_v35 }
 0x2ab   :  { %v1706_v0 = vunpack.i.h.bf16 %v3051_v23  ;;  %v1705_v54 = vunpack.i.l.bf16 %v3051_v23  ;;  %v1711_v47 = vunpack.i.h.bf16 %v3053_v33  ;;  %v1710_v61 = vunpack.i.l.bf16 %v3053_v33 }
 0x2ac   :  { %1284 = vmatmul.mubr.msk.bf16.vlgmr.msra.gmra.mrb[8].mxu0 %vm1050_vm15, %v3041_v1  ;;  %1113 = vmatprep.subr.bf16.mxu0 %v1022_v12 }
 0x2ad   :  { %v924_v51 = vsel %vm920_vm12, %v1666_v38, %v1705_v54  ;;  %v943_v63 = vsel %vm939_vm13, %v1671_v36, %v1710_v61  ;;  %1114 = vmatpush1.bf16.msra.mxu0 %v1021_v48  ;;  %v923_v9 = vsel %vm920_vm12, %v1705_v54, %v1706_v0  ;;  %v942_v52 = vsel %vm939_vm13, %v1710_v61, %v1711_v47 }
 0x2ae   :  { %v1027_v22 = vpack.c.bf16 %v943_v63, %v924_v51  ;;  %v3077_v27 = vpop.permute.xlu0 %1713  ;;  %v3079_v38 = vpop.permute.xlu1 %1718  ;;  %v1028_v14 = vpack.c.bf16 %v942_v52, %v923_v9  ;;  %1145 = vmatprep.mubr.bf16.mxu0 %v3306_v11 }
 0x2af   :  { %v1716_v36 = vunpack.i.h.bf16 %v3077_v27  ;;  %v1715_v15 = vunpack.i.l.bf16 %v3077_v27  ;;  %v1721_v55 = vunpack.i.h.bf16 %v3079_v38  ;;  %v1720_v20 = vunpack.i.l.bf16 %v3079_v38 }
 0x2b0   :  { %1115 = vmatprep.subr.bf16.mxu0 %v1028_v14 }
 0x2b1   :  { %v960_v10 = vsel %vm89_vm1, %v1676_v17, %v1715_v15  ;;  %1116 = vmatpush1.bf16.msra.mxu0 %v1027_v22  ;;  %v959_v35 = vsel %vm89_vm1, %v1715_v15, %v1716_v36  ;;  %v979_v58 = vsel %vm976_vm14, %v1681_v8, %v1720_v20  ;;  %v978_v17 = vsel %vm976_vm14, %v1720_v20, %v1721_v55 }
 0x2b2   :  { %v1033_v3 = vpack.c.bf16 %v960_v10, %v2853_v57  ;;  %v1724_v48 = vpop.permute.xlu0 %1723  ;;  %v1729_v12 = vpop.permute.xlu1 %1728  ;;  %v1034_v54 = vpack.c.bf16 %v959_v35, %v2867_v41 }
 0x2b3   :  { %v1726_v61 = vunpack.i.h.bf16 %v1724_v48  ;;  %v1725_v51 = vunpack.i.l.bf16 %v1724_v48  ;;  %v1731_v63 = vunpack.i.h.bf16 %v1729_v12  ;;  %v1730_v9 = vunpack.i.l.bf16 %v1729_v12 }
 0x2b4   :  { %1117 = vmatprep.subr.bf16.mxu0 %v1034_v54 }
 0x2b5   :  { %v997_v57 = vsel %vm199_vm3, %v1691_v19, %v1725_v51  ;;  %v1014_v41 = vsel %vm254_vm4, %v1730_v9, %v1731_v63  ;;  %1118 = vmatpush1.bf16.msra.mxu0 %v1033_v3  ;;  %v996_v40 = vsel %vm199_vm3, %v1725_v51, %v1726_v61  ;;  %v1015_v8 = vsel %vm254_vm4, %v3009_v7, %v1730_v9 }
 0x2b6   :  { %v1039_v52 = vpack.c.bf16 %v997_v57, %v979_v58  ;;  %v879_v22 = vpop.permute.xlu0 %878  ;;  %v898_v27 = vpop.permute.xlu1 %897  ;;  %v1040_v14 = vpack.c.bf16 %v996_v40, %v978_v17  ;;  %v1046_v15 = vpack.c.bf16 %v1014_v41, %v1014_v41  ;;  %v1045_v62 = vpack.c.bf16 %v1015_v8, %v1015_v8 }
 0x2b7   :  { %v883_v19 = vsel %vm882_vm10, %v879_v22, %v2931_v53  ;;  %v902_v20 = vsel %vm901_vm11, %v898_v27, %v2933_v21  ;;  %v884_v7 = vsel %vm882_vm10, %v1696_v28, %v879_v22  ;;  %v903_v3 = vsel %vm901_vm11, %v1701_v60, %v898_v27 }
 0x2b8   :  { %1119 = vmatprep.subr.bf16.mxu0 %v1040_v14  ;;  %v1024_v53 = vpack.c.bf16 %v902_v20, %v883_v19  ;;  %v1061_v48 = vsel %vm620_vm9, %v1045_v62, 0  ;;  %v1023_v28 = vpack.c.bf16 %v903_v3, %v884_v7 }
 0x2b9   :  { %1120 = vmatpush1.bf16.msra.mxu0 %v1039_v52 }
 0x2ba   :  { %v917_v10 = vpop.permute.xlu0 %916  ;;  %v936_v35 = vpop.permute.xlu1 %935  ;;  %1285 = vmatprep.subr.msk.bf16.mxu0 %vm620_vm9, %v1046_v15 }
 0x2bb   :  { %v921_v21 = vsel %vm920_vm12, %v917_v10, %v2959_v32  ;;  %v940_v12 = vsel %vm939_vm13, %v936_v35, %v2961_v2  ;;  %v922_v44 = vsel %vm920_vm12, %v1706_v0, %v917_v10  ;;  %v941_v60 = vsel %vm939_vm13, %v1711_v47, %v936_v35 }
 0x2bc   :  { %v1030_v54 = vpack.c.bf16 %v940_v12, %v921_v21  ;;  %v1029_v0 = vpack.c.bf16 %v941_v60, %v922_v44 }
 0x2bd   :  { %1122 = vmatpush1.bf16.msra.mxu0 %v1061_v48 }
 0x2be   :  { %v957_v25 = vpop.permute.xlu0 %956  ;;  %1154 = vmatprep.subr.bf16.mxu0 %v1024_v53  ;;  %v975_v32 = vpop.permute.xlu1 %974 }
 0x2bf   :  { %v963_v2 = vsel %vm89_vm1, %v957_v25, %v2895_v59  ;;  %v958_v33 = vsel %vm89_vm1, %v1716_v36, %v957_v25 }
 0x2c0   :  { %1286 = vmatmul.mubr.msk.bf16.vlgmr.msra.gmra.mrb[12].mxu0 %vm1050_vm15, %v3041_v1  ;;  %v1036_v47 = vpack.c.bf16 %v963_v2, %v2844_v18  ;;  %v1035_v59 = vpack.c.bf16 %v958_v33, %v2877_v56  ;;  %v977_v56 = vsel %vm976_vm14, %v1721_v55, %v975_v32 }
 0x2c1   :  { %1155 = vmatpush1.bf16.msra.mxu0 %v1023_v28  ;;  %1186 = vmatprep.mubr.bf16.mxu0 %v3306_v11  ;;  %v982_v11 = vsel %vm976_vm14, %v975_v32, %v2929_v13 }
 0x2c2   :  { %v994_v23 = vpop.permute.xlu0 %993  ;;  %1156 = vmatprep.subr.bf16.mxu0 %v1030_v54  ;;  %v1012_v9 = vpop.permute.xlu1 %1011 }
 0x2c3   :  { %v1000_v51 = vsel %vm199_vm3, %v994_v23, %v2971_v46  ;;  %v995_v58 = vsel %vm199_vm3, %v1726_v61, %v994_v23  ;;  %v1013_v18 = vsel %vm254_vm4, %v1731_v63, %v1012_v9  ;;  %v1018_v46 = vsel %vm254_vm4, %v1012_v9, %v1685_v50  ;;  %v736_v50 = vpop.f32.mrb[13].mxu1 }
 0x2c4   :  { %v1042_v17 = vpack.c.bf16 %v1000_v51, %v982_v11  ;;  %v1041_v13 = vpack.c.bf16 %v995_v58, %v977_v56  ;;  %v1047_v36 = vpack.c.bf16 %v1013_v18, %v1013_v18  ;;  %v1048_v57 = vpack.c.bf16 %v1018_v46, %v1018_v46  ;;  %v738_v63 = vpop.f32.mrb[14].mxu1 }
 0x2c5   :  { %1157 = vmatpush1.bf16.msra.mxu0 %v1029_v0  ;;  %v739_v38 = vpop.f32.mrb[15].mxu1 }
 0x2c6   :  { %1158 = vmatprep.subr.bf16.mxu0 %v1036_v47  ;;  %v1067_v61 = vsel %vm620_vm9, %v1047_v36, 0 }
 0x2c9   :  { %1159 = vmatpush1.bf16.msra.mxu0 %v1035_v59 }
 0x2ca   :  { %1160 = vmatprep.subr.bf16.mxu0 %v1042_v17 }
 0x2cd   :  { %1161 = vmatpush1.bf16.msra.mxu0 %v1041_v13 }
 0x2ce   :  { %1287 = vmatprep.subr.msk.bf16.mxu0 %vm620_vm9, %v1048_v57 }
 0x2d1   :  { %1163 = vmatpush1.bf16.msra.mxu0 %v1067_v61 }
 0x2d3   :  { %v586_v41 = vpop.permute.xlu0 %585  ;;  %v3179_v19 = vpop.permute.xlu1 %595 }
 0x2d4   :  { %1288 = vmatmul.mubr.msk.bf16.vlgmr.msra.gmra.mrb[4].mxu0 %vm1050_vm15, %v3041_v1  ;;  %v674_v45 = vadd.f32 %v2813_v30, %v586_v41  ;;  %v676_v55 = vadd.f32 %v2815_v49, %v586_v41  ;;  %v725_v27 = vadd.f32 %v2839_v34, %v586_v41  ;;  %v727_v14 = vadd.f32 %v2841_v39, %v586_v41 }
 0x2d5   :  { %v684_v30 = vadd.f32 %v2817_v26, %v3179_v19  ;;  %v686_v10 = vadd.f32 %v2819_v37, %v3179_v19  ;;  %v776_v26 = vadd.f32 %v2835_v24, %v586_v41  ;;  %v778_v60 = vadd.f32 %v2837_v31, %v586_v41 }
 0x2d6   :  { %v1271_v40 = vmul.f32 -1.442695, %v674_v45  ;;  %v1272_v8 = vmul.f32 -1.442695, %v676_v55  ;;  %v1273_v62 = vmul.f32 -1.442695, %v725_v27  ;;  %v735_v11 = vadd.f32 %v734_v16, %v3179_v19 }
 0x2d7   :  { %v1274_v20 = vmul.f32 -1.442695, %v727_v14  ;;  %v1275_v47 = vmul.f32 -1.442695, %v776_v26  ;;  %v1276_v9 = vmul.f32 -1.442695, %v778_v60  ;;  %v737_v31 = vadd.f32 %v736_v50, %v3179_v19 }
 0x2d8   :  { %1762 = vpow2.f32 %v1271_v40 }
 0x2d9   :  { %1764 = vpow2.f32 %v1272_v8 }
 0x2e2   :  { %v1763_v52 = vpop.eup %1762 }
 0x2e3   :  { %v1765_v22 = vpop.eup %1764  ;;  %v810_v1 = vadd.f32 1.0, %v1763_v52 }
 0x2e4   :  { %v811_v15 = vadd.f32 1.0, %v1765_v22 }
 0x2e5   :  { %1766 = vrcp.f32 %v810_v1 }
 0x2e6   :  { %1768 = vrcp.f32 %v811_v15 }
 0x2e7   :  { %1770 = vpow2.f32 %v1273_v62 }
 0x2e8   :  { %1772 = vpow2.f32 %v1274_v20 }
 0x2ef   :  { %v1767_v53 = vpop.eup %1766 }
 0x2f0   :  { %v1769_v48 = vpop.eup %1768  ;;  %v1207_v12 = vsub.f32 1.0, %v1767_v53 }
 0x2f1   :  { %v1771_v21 = vpop.eup %1770  ;;  %v1208_v28 = vsub.f32 1.0, %v1769_v48 }
 0x2f2   :  { %v1773_v25 = vpop.eup %1772  ;;  %v812_v37 = vadd.f32 1.0, %v1771_v21  ;;  %v1213_v2 = vmul.f32 %v1207_v12, %v3307_v42 }
 0x2f3   :  { %v813_v32 = vadd.f32 1.0, %v1773_v25  ;;  %v1214_v0 = vmul.f32 %v1208_v28, %v3308_v5 }
 0x37f   :  { %v1106_v49 = vpop.f32.mrb[8].mxu0 }
 0x380   :  { %v1195_v34 = vadd.f32 %v1106_v49, %v684_v30  ;;  %v1108_v35 = vpop.f32.mrb[9].mxu0 }
 0x381   :  { %v1196_v39 = vadd.f32 %v1108_v35, %v686_v10  ;;  %v1110_v7 = vpop.f32.mrb[10].mxu0 }
 0x382   :  { %1774 = vtanh.f32 %v1195_v34  ;;  %v1111_v3 = vpop.f32.mrb[11].mxu0 }
 0x383   :  { %1776 = vtanh.f32 %v1196_v39 }
 0x384   :  { %1778 = vrcp.f32 %v812_v37 }
 0x385   :  { %1780 = vrcp.f32 %v813_v32 }
 0x386   :  { %1782 = vpow2.f32 %v1275_v47 }
 0x387   :  { %1784 = vpow2.f32 %v1276_v9 }
 0x38c   :  { %v1775_v44 = vpop.eup %1774 }
 0x38d   :  { %v1777_v54 = vpop.eup %1776  ;;  %v1219_v23 = vmul.f32 %v1775_v44, %v1767_v53 }
 0x38e   :  { %v1220_v33 = vmul.f32 %v1777_v54, %v1769_v48  ;;  %v1779_v13 = vpop.eup %1778 }
 0x38f   :  { %v1225_v51 = vadd.f32 %v1219_v23, %v1213_v2  ;;  %v1781_v36 = vpop.eup %1780  ;;  %v1209_v61 = vsub.f32 1.0, %v1779_v13 }
 0x390   :  { %v1226_v59 = vadd.f32 %v1220_v33, %v1214_v0  ;;  %v1783_v57 = vpop.eup %1782  ;;  %v1210_v63 = vsub.f32 1.0, %v1781_v36 }
 0x391   :  { %v1231_v24 = vmax.f32 %v1225_v51, 0.0  ;;  %v1785_v16 = vpop.eup %1784  ;;  %v814_v38 = vadd.f32 1.0, %v1783_v57  ;;  %v1215_v55 = vmul.f32 %v1209_v61, %v2649_v43 }
 0x392   :  { %v1232_v58 = vmax.f32 %v1226_v59, 0.0  ;;  %v815_v45 = vadd.f32 1.0, %v1785_v16  ;;  %v1216_v8 = vmul.f32 %v1210_v63, %v2644_v4 }
 0x393   :  { %1237 = vst [vmem:[#allocation5] sm:$0xff] %v1231_v24  ;;  %v1147_v17 = vpop.f32.mrb[12].mxu0 }
 0x394   :  { %1238 = vst [vmem:[#allocation5 + $0x8] sm:$0xff] %v1232_v58  ;;  %v1197_v42 = vadd.f32 %v1147_v17, %v735_v11  ;;  %v1149_v5 = vpop.f32.mrb[13].mxu0 }
 0x395   :  { %v1198_v18 = vadd.f32 %v1149_v5, %v737_v31  ;;  %v1151_v46 = vpop.f32.mrb[14].mxu0 }
 0x396   :  { %1786 = vtanh.f32 %v1197_v42  ;;  %v1152_v56 = vpop.f32.mrb[15].mxu0 }
 0x397   :  { %1788 = vtanh.f32 %v1198_v18 }
 0x398   :  { %1790 = vrcp.f32 %v814_v38 }
 0x399   :  { %1792 = vrcp.f32 %v815_v45 }
 0x3a0   :  { %v1787_v50 = vpop.eup %1786 }
 0x3a1   :  { %v1789_v41 = vpop.eup %1788  ;;  %v1221_v40 = vmul.f32 %v1787_v50, %v1779_v13 }
 0x3a2   :  { %v1222_v52 = vmul.f32 %v1789_v41, %v1781_v36  ;;  %v1791_v4 = vpop.eup %1790 }
 0x3a3   :  { %v1227_v22 = vadd.f32 %v1221_v40, %v1215_v55  ;;  %v1793_v10 = vpop.eup %1792  ;;  %v1211_v34 = vsub.f32 1.0, %v1791_v4 }
 0x3a4   :  { %v1228_v27 = vadd.f32 %v1222_v52, %v1216_v8  ;;  %v1212_v35 = vsub.f32 1.0, %v1793_v10 }
 0x3a5   :  { %v1233_v14 = vmax.f32 %v1227_v22, 0.0  ;;  %v1217_v3 = vmul.f32 %v1211_v34, %v2614_v6 }
 0x3a6   :  { %v1234_v1 = vmax.f32 %v1228_v27, 0.0  ;;  %v1218_v48 = vmul.f32 %v1212_v35, %v2605_v29 }
 0x3a7   :  { %1239 = vst [vmem:[#allocation5 + $0x10] sm:$0xff] %v1233_v14  ;;  %v1188_v15 = vpop.f32.mrb[4].mxu0 }
 0x3a8   :  { %1240 = vst [vmem:[#allocation5 + $0x18] sm:$0xff] %v1234_v1  ;;  %v1297_v62 = vadd.f32 %v1188_v15, %v3179_v19  ;;  %v1190_v20 = vpop.f32.mrb[5].mxu0 }
 0x3a9   :  { %v1298_v30 = vadd.f32 %v1190_v20, %v3179_v19  ;;  %v1192_v49 = vpop.f32.mrb[6].mxu0 }
 0x3aa   :  { %1794 = vtanh.f32 %v1297_v62  ;;  %v1193_v43 = vpop.f32.mrb[7].mxu0 }
 0x3ab   :  { %1796 = vtanh.f32 %v1298_v30 }
 0x3b4   :  { %v1795_v39 = vpop.eup %1794 }
 0x3b5   :  { %v1797_v7 = vpop.eup %1796  ;;  %v1223_v53 = vmul.f32 %v1795_v39, %v1791_v4 }
 0x3b6   :  { %v1224_v21 = vmul.f32 %v1797_v7, %v1793_v10 }
 0x3b7   :  { %v1229_v12 = vadd.f32 %v1223_v53, %v1217_v3 }
 0x3b8   :  { %v1230_v19 = vadd.f32 %v1224_v21, %v1218_v48 }
 0x3b9   :  { %v1235_v25 = vmax.f32 %v1229_v12, 0.0 }
 0x3ba   :  { %v1236_v28 = vmax.f32 %v1230_v19, 0.0 }
 0x3bb   :  { %1241 = vst [vmem:[#allocation5 + $0x20] sm:$0xff] %v1235_v25 }
 0x3bc   :  { %1242 = vst [vmem:[#allocation5 + $0x28] sm:$0xff] %v1236_v28 }
 0x3bd   :  { %1831 = shalt.err (!%p1828_p12)
}
 0x3be   :  { %s1832_s30 = scalar_lea.hbm %s3213_s4, 768 }
 0x3bf   :  { %p1833_p13 = scmp.ne.s32.totalorder %s3213_s4, %s1832_s30  ;;  %p1836_p0 = scmp.lt.u32.totalorder %s1832_s30, %s3213_s4 }
 0x3c1   :  { %p1838_p1 = pnand %p1836_p0, %p1833_p13 }
 0x3c3   :  { %1841 = shalt.err (!%p1838_p1)
}
 0x3c4   :  { %1252 = dma.vmem_to_hbm [thread:$0]  %s1250_s27, 768, %s3213_s4, [#allocation4]  }
 0x3c5   :  { %1844 = dma.done.wait [#allocation4], 768  }
 0x3c6   :  { %1845 = vsyncadd [#allocation4], 4294966528 }
 0x3c7   :  { %1256 = vsyncpa [#allocation3], 1 }
 0x3c8   :  { %1257 = vsyncpa [#allocation4], 1 }

</bundles_post_ra>
